<compile_context>
chip_gen: v5e
topology: v5e:2x2
jax: 0.10.0
libtpu: 0.0.40
codegen_flags: <defaults>
</compile_context>

<pallas_src>
import math

import jax
import jax.numpy as jnp
from jax.experimental import pallas as pl
from jax.experimental.pallas import tpu as pltpu


# ----------------------------------------------------------------------------
# Single fused kernel: encoder -> reparameterized latent -> GRU decoder
# ----------------------------------------------------------------------------
def _vae_fused_kernel(x_ref, wconv_ref, bconv_ref, wdense_ref, bdense_ref,
                      wmu_ref, bmu_ref, wls_ref, bls_ref, eps_ref,
                      wihe_ref, bih_ref, whh_ref, bhh_ref, wout_ref, bout_ref,
                      out_ref, mu_ref, sig_ref, hs_scr):
    """x_ref is time-major one-hot (T, B, V).  All intermediates stay in VMEM.

    Encoder: conv tap k contributes x[p+k] @ w_conv[k]; the post-ReLU conv
    feature at position p is contracted against w_dense[p] (dense weight
    pre-reshaped to (P, C1, 435)) — exactly flatten + Linear, no reshapes.
    Decoder: teacher forcing with ratio=1; because x is one-hot, the decoder
    input at step t>=1 is x[t-1] @ (emb @ W_ih) and at t=0 it is row 2 of the
    same folded table.  Gate order: r | z | n (PyTorch GRU convention).
    """
    T, B, V = x_ref.shape
    K = wconv_ref.shape[0]
    P = T - K + 1
    H = whh_ref.shape[0]

    # ------------------------- encoder --------------------------------------
    h_pre = bdense_ref[...]                                  # (1, 435) broadcasts up
    for p in range(P):                                       # static unroll (small P)
        conv_p = bconv_ref[...]                              # (1, C1)
        for k in range(K):                                   # static unroll (K=3)
            conv_p = conv_p + jnp.dot(x_ref[p + k], wconv_ref[k],
                                      preferred_element_type=jnp.float32)
        conv_p = jnp.maximum(conv_p, 0.0)                    # ReLU after conv
        h_pre = h_pre + jnp.dot(conv_p, wdense_ref[p],
                                preferred_element_type=jnp.float32)
    h_enc = jnp.maximum(h_pre, 0.0)                          # ReLU after dense-435

    # ------------------------- latent sampling ------------------------------
    mu = jnp.dot(h_enc, wmu_ref[...],
                 preferred_element_type=jnp.float32) + bmu_ref[...]
    log_sigma = jnp.dot(h_enc, wls_ref[...],
                        preferred_element_type=jnp.float32) + bls_ref[...]
    sigma = jnp.exp(0.5 * log_sigma)
    mu_ref[...] = mu
    sig_ref[...] = sigma
    hidden = mu + sigma * eps_ref[...]                       # z; decoder h0 (B, H)

    # ------------------------- GRU decoder (teacher forced) -----------------
    # start token = 2: its folded input-gate row, built via a one-hot matmul.
    start_oh = (jax.lax.broadcasted_iota(jnp.int32, (1, V), 1) == 2
                ).astype(jnp.float32)                        # (1, V)
    g_start = jnp.dot(start_oh, wihe_ref[...],
                      preferred_element_type=jnp.float32) + bih_ref[...]  # (1, 3H)

    for t in range(T):                                       # static unroll, T small
        if t == 0:
            gxt = g_start                                    # broadcasts over batch
        else:
            gxt = jnp.dot(x_ref[t - 1], wihe_ref[...],
                          preferred_element_type=jnp.float32) + bih_ref[...]  # (B,3H)
        gh = jnp.dot(hidden, whh_ref[...],
                     preferred_element_type=jnp.float32) + bhh_ref[...]        # (B,3H)

        r = jax.nn.sigmoid(gxt[:, :H] + gh[:, :H])
        zg = jax.nn.sigmoid(gxt[:, H:2 * H] + gh[:, H:2 * H])
        n = jnp.tanh(gxt[:, 2 * H:] + r * gh[:, 2 * H:])
        hidden = (1.0 - zg) * n + zg * hidden

        hs_scr[pl.ds(t * B, B), :] = hidden                  # stash for hoisted proj

    # ------------------------- hoisted output projection --------------------
    out_ref[...] = (jnp.dot(hs_scr[...], wout_ref[...],
                            preferred_element_type=jnp.float32)
                    + bout_ref[...])                         # (T*B, V)


def vae_fused_forward(x_tbv, eps, w_ihe, params):
    T, B, V = x_tbv.shape
    L = eps.shape[1]
    return pl.pallas_call(
        _vae_fused_kernel,
        out_shape=(
            jax.ShapeDtypeStruct((T * B, V), jnp.float32),   # time-major logits
            jax.ShapeDtypeStruct((B, L), jnp.float32),       # z_mean
            jax.ShapeDtypeStruct((B, L), jnp.float32),       # z_sigma
        ),
        scratch_shapes=[
            pltpu.VMEM((T * B, L), jnp.float32),             # all hidden states
        ],
    )(x_tbv, params["w_conv"], params["b_conv"], params["w_dense"],
      params["b_dense"], params["w_mu"], params["b_mu"], params["w_ls"],
      params["b_ls"], eps, w_ihe, params["b_ih"], params["w_hh"],
      params["b_hh"], params["w_out"], params["b_out"])


# ----------------------------------------------------------------------------
# Parameter construction (deterministic, xavier-uniform like init_weights_2)
# ----------------------------------------------------------------------------
def xavier_uniform(key, shape):
    fan_in, fan_out = shape[-2], shape[-1]
    limit = math.sqrt(6.0 / (fan_in + fan_out))
    return jax.random.uniform(key, shape, jnp.float32, -limit, limit)


def make_params(key, *, V, T, L, E, C1, K):
    P = T - K + 1                       # conv output length
    ks = jax.random.split(key, 8)
    return dict(
        # encoder
        w_conv=xavier_uniform(ks[0], (K, V, C1)),            # per-tap conv weights
        b_conv=jnp.zeros((1, C1), jnp.float32),
        w_dense=xavier_uniform(ks[1], (P, C1, 435)),          # flatten folded into shape
        b_dense=jnp.zeros((1, 435), jnp.float32),
        # VAE head (Linear(435, latent_dim) x2)
        w_mu=xavier_uniform(ks[2], (435, L)),
        b_mu=jnp.zeros((1, L), jnp.float32),
        w_ls=xavier_uniform(ks[3], (435, L)),
        b_ls=jnp.zeros((1, L), jnp.float32),
        # decoder (gates concatenated: r|z|n)
        emb=xavier_uniform(ks[4], (V, E)),
        w_ih=xavier_uniform(ks[5], (E, 3 * L)),
        w_hh=xavier_uniform(ks[6], (L, 3 * L)),
        b_ih=jnp.zeros((1, 3 * L), jnp.float32),
        b_hh=jnp.zeros((1, 3 * L), jnp.float32),
        w_out=xavier_uniform(ks[7], (L, V)),
        b_out=jnp.zeros((1, V), jnp.float32),
    )


# ----------------------------------------------------------------------------
# Full forward (Molecule_VAE.forward)
# ----------------------------------------------------------------------------
@jax.jit
def molecule_vae_forward(x, eps, params):
    """x: (B, T, V) one-hot float32, eps: (B, L) standard-normal noise."""
    B, T, V = x.shape

    # Fold Embedding + GRU input projection into one (V, 3H) table: the decoder
    # inputs are one-hot, so Embedding followed by W_ih is a row lookup in
    # emb @ W_ih.  Parameter-only work; could be precomputed offline.
    w_ihe = jnp.dot(params["emb"], params["w_ih"])

    x_tbv = jnp.transpose(x, (1, 0, 2))                            # (T, B, V)
    out_flat, z_mean, z_sigma = vae_fused_forward(x_tbv, eps, w_ihe, params)

    recon_x = jnp.transpose(out_flat.reshape(T, B, V), (1, 0, 2))  # (B, T, V)
    return recon_x, z_mean, z_sigma


# ----------------------------------------------------------------------------
if __name__ == "__main__":
    B, T, V = 2, 8, 16          # batch, seq_len, vocab_size
    L, E, C1, K = 32, 32, 8, 3  # latent_dim, embed_dim, conv channels, conv kernel

    key = jax.random.PRNGKey(0)
    k_tok, k_eps, k_par = jax.random.split(key, 3)

    tokens = jax.random.randint(k_tok, (B, T), 0, V)
    x = jax.nn.one_hot(tokens, V, dtype=jnp.float32)          # (B, T, V)
    eps = jax.random.normal(k_eps, (B, L), jnp.float32)       # reparameterization noise
    params = make_params(k_par, V=V, T=T, L=L, E=E, C1=C1, K=K)

    recon_x, z_mean, z_sigma = molecule_vae_forward(x, eps, params)
    jax.block_until_ready((recon_x, z_mean, z_sigma))

    assert recon_x.shape == (B, T, V)
    assert z_mean.shape == (B, L) and z_sigma.shape == (B, L)
    print("KERNEL_OK")
</pallas_src>

<mosaic_0001>
module attributes {stable_mosaic.version = 11 : i64} {
  func.func @_vae_fused_kernel(%arg0: memref<8x2x16xf32, #tpu.memory_space<vmem>>, %arg1: memref<3x16x8xf32, #tpu.memory_space<vmem>>, %arg2: memref<1x8xf32, #tpu.memory_space<vmem>>, %arg3: memref<6x8x435xf32, #tpu.memory_space<vmem>>, %arg4: memref<1x435xf32, #tpu.memory_space<vmem>>, %arg5: memref<435x32xf32, #tpu.memory_space<vmem>>, %arg6: memref<1x32xf32, #tpu.memory_space<vmem>>, %arg7: memref<435x32xf32, #tpu.memory_space<vmem>>, %arg8: memref<1x32xf32, #tpu.memory_space<vmem>>, %arg9: memref<2x32xf32, #tpu.memory_space<vmem>>, %arg10: memref<16x96xf32, #tpu.memory_space<vmem>>, %arg11: memref<1x96xf32, #tpu.memory_space<vmem>>, %arg12: memref<32x96xf32, #tpu.memory_space<vmem>>, %arg13: memref<1x96xf32, #tpu.memory_space<vmem>>, %arg14: memref<32x16xf32, #tpu.memory_space<vmem>>, %arg15: memref<1x16xf32, #tpu.memory_space<vmem>>, %arg16: memref<16x16xf32, #tpu.memory_space<vmem>>, %arg17: memref<2x32xf32, #tpu.memory_space<vmem>>, %arg18: memref<2x32xf32, #tpu.memory_space<vmem>>, %arg19: memref<16x32xf32, #tpu.memory_space<vmem>>) attributes {dimension_semantics = [], scalar_prefetch = 0 : i64, scratch_operands = 1 : i64, tpu.core_type = #tpu.core_type<tc>} {
    %c0 = arith.constant 0 : index
    %c0_0 = arith.constant 0 : index
    %0 = vector.load %arg4[%c0, %c0_0] : memref<1x435xf32, #tpu.memory_space<vmem>>, vector<1x435xf32>
    %c0_1 = arith.constant 0 : index
    %c0_2 = arith.constant 0 : index
    %1 = vector.load %arg2[%c0_1, %c0_2] : memref<1x8xf32, #tpu.memory_space<vmem>>, vector<1x8xf32>
    %c0_3 = arith.constant 0 : index
    %c0_4 = arith.constant 0 : index
    %c0_5 = arith.constant 0 : index
    %2 = vector.load %arg0[%c0_3, %c0_4, %c0_5] : memref<8x2x16xf32, #tpu.memory_space<vmem>>, vector<1x2x16xf32>
    %3 = vector.shape_cast %2 : vector<1x2x16xf32> to vector<2x16xf32>
    %c0_6 = arith.constant 0 : index
    %c0_7 = arith.constant 0 : index
    %c0_8 = arith.constant 0 : index
    %4 = vector.load %arg1[%c0_6, %c0_7, %c0_8] : memref<3x16x8xf32, #tpu.memory_space<vmem>>, vector<1x16x8xf32>
    %5 = vector.shape_cast %4 : vector<1x16x8xf32> to vector<16x8xf32>
    %cst = arith.constant dense<0.000000e+00> : vector<2x8xf32>
    %6 = tpu.matmul %3, %5, %cst {dimension_numbers = #tpu.dot_dimension_numbers<[1], [0], [0], [1], [0, 0, 1, 1], [], []>} : vector<2x16xf32>, vector<16x8xf32>, vector<2x8xf32> -> vector<2x8xf32>
    %7 = vector.broadcast %1 : vector<1x8xf32> to vector<2x8xf32>
    %8 = arith.addf %7, %6 : vector<2x8xf32>
    %c1 = arith.constant 1 : index
    %c0_9 = arith.constant 0 : index
    %c0_10 = arith.constant 0 : index
    %9 = vector.load %arg0[%c1, %c0_9, %c0_10] : memref<8x2x16xf32, #tpu.memory_space<vmem>>, vector<1x2x16xf32>
    %10 = vector.shape_cast %9 : vector<1x2x16xf32> to vector<2x16xf32>
    %c1_11 = arith.constant 1 : index
    %c0_12 = arith.constant 0 : index
    %c0_13 = arith.constant 0 : index
    %11 = vector.load %arg1[%c1_11, %c0_12, %c0_13] : memref<3x16x8xf32, #tpu.memory_space<vmem>>, vector<1x16x8xf32>
    %12 = vector.shape_cast %11 : vector<1x16x8xf32> to vector<16x8xf32>
    %cst_14 = arith.constant dense<0.000000e+00> : vector<2x8xf32>
    %13 = tpu.matmul %10, %12, %cst_14 {dimension_numbers = #tpu.dot_dimension_numbers<[1], [0], [0], [1], [0, 0, 1, 1], [], []>} : vector<2x16xf32>, vector<16x8xf32>, vector<2x8xf32> -> vector<2x8xf32>
    %14 = arith.addf %8, %13 : vector<2x8xf32>
    %c2 = arith.constant 2 : index
    %c0_15 = arith.constant 0 : index
    %c0_16 = arith.constant 0 : index
    %15 = vector.load %arg0[%c2, %c0_15, %c0_16] : memref<8x2x16xf32, #tpu.memory_space<vmem>>, vector<1x2x16xf32>
    %16 = vector.shape_cast %15 : vector<1x2x16xf32> to vector<2x16xf32>
    %c2_17 = arith.constant 2 : index
    %c0_18 = arith.constant 0 : index
    %c0_19 = arith.constant 0 : index
    %17 = vector.load %arg1[%c2_17, %c0_18, %c0_19] : memref<3x16x8xf32, #tpu.memory_space<vmem>>, vector<1x16x8xf32>
    %18 = vector.shape_cast %17 : vector<1x16x8xf32> to vector<16x8xf32>
    %cst_20 = arith.constant dense<0.000000e+00> : vector<2x8xf32>
    %19 = tpu.matmul %16, %18, %cst_20 {dimension_numbers = #tpu.dot_dimension_numbers<[1], [0], [0], [1], [0, 0, 1, 1], [], []>} : vector<2x16xf32>, vector<16x8xf32>, vector<2x8xf32> -> vector<2x8xf32>
    %20 = arith.addf %14, %19 : vector<2x8xf32>
    %cst_21 = arith.constant 0.000000e+00 : f32
    %21 = vector.broadcast %cst_21 : f32 to vector<2x8xf32>
    %22 = arith.maximumf %20, %21 : vector<2x8xf32>
    %c0_22 = arith.constant 0 : index
    %c0_23 = arith.constant 0 : index
    %c0_24 = arith.constant 0 : index
    %23 = vector.load %arg3[%c0_22, %c0_23, %c0_24] : memref<6x8x435xf32, #tpu.memory_space<vmem>>, vector<1x8x435xf32>
    %24 = vector.shape_cast %23 : vector<1x8x435xf32> to vector<8x435xf32>
    %cst_25 = arith.constant dense<0.000000e+00> : vector<2x435xf32>
    %25 = tpu.matmul %22, %24, %cst_25 {dimension_numbers = #tpu.dot_dimension_numbers<[1], [0], [0], [1], [0, 0, 1, 1], [], []>} : vector<2x8xf32>, vector<8x435xf32>, vector<2x435xf32> -> vector<2x435xf32>
    %26 = vector.broadcast %0 : vector<1x435xf32> to vector<2x435xf32>
    %27 = arith.addf %26, %25 : vector<2x435xf32>
    %c0_26 = arith.constant 0 : index
    %c0_27 = arith.constant 0 : index
    %28 = vector.load %arg2[%c0_26, %c0_27] : memref<1x8xf32, #tpu.memory_space<vmem>>, vector<1x8xf32>
    %c1_28 = arith.constant 1 : index
    %c0_29 = arith.constant 0 : index
    %c0_30 = arith.constant 0 : index
    %29 = vector.load %arg0[%c1_28, %c0_29, %c0_30] : memref<8x2x16xf32, #tpu.memory_space<vmem>>, vector<1x2x16xf32>
    %30 = vector.shape_cast %29 : vector<1x2x16xf32> to vector<2x16xf32>
    %c0_31 = arith.constant 0 : index
    %c0_32 = arith.constant 0 : index
    %c0_33 = arith.constant 0 : index
    %31 = vector.load %arg1[%c0_31, %c0_32, %c0_33] : memref<3x16x8xf32, #tpu.memory_space<vmem>>, vector<1x16x8xf32>
    %32 = vector.shape_cast %31 : vector<1x16x8xf32> to vector<16x8xf32>
    %cst_34 = arith.constant dense<0.000000e+00> : vector<2x8xf32>
    %33 = tpu.matmul %30, %32, %cst_34 {dimension_numbers = #tpu.dot_dimension_numbers<[1], [0], [0], [1], [0, 0, 1, 1], [], []>} : vector<2x16xf32>, vector<16x8xf32>, vector<2x8xf32> -> vector<2x8xf32>
    %34 = vector.broadcast %28 : vector<1x8xf32> to vector<2x8xf32>
    %35 = arith.addf %34, %33 : vector<2x8xf32>
    %c2_35 = arith.constant 2 : index
    %c0_36 = arith.constant 0 : index
    %c0_37 = arith.constant 0 : index
    %36 = vector.load %arg0[%c2_35, %c0_36, %c0_37] : memref<8x2x16xf32, #tpu.memory_space<vmem>>, vector<1x2x16xf32>
    %37 = vector.shape_cast %36 : vector<1x2x16xf32> to vector<2x16xf32>
    %c1_38 = arith.constant 1 : index
    %c0_39 = arith.constant 0 : index
    %c0_40 = arith.constant 0 : index
    %38 = vector.load %arg1[%c1_38, %c0_39, %c0_40] : memref<3x16x8xf32, #tpu.memory_space<vmem>>, vector<1x16x8xf32>
    %39 = vector.shape_cast %38 : vector<1x16x8xf32> to vector<16x8xf32>
    %cst_41 = arith.constant dense<0.000000e+00> : vector<2x8xf32>
    %40 = tpu.matmul %37, %39, %cst_41 {dimension_numbers = #tpu.dot_dimension_numbers<[1], [0], [0], [1], [0, 0, 1, 1], [], []>} : vector<2x16xf32>, vector<16x8xf32>, vector<2x8xf32> -> vector<2x8xf32>
    %41 = arith.addf %35, %40 : vector<2x8xf32>
    %c3 = arith.constant 3 : index
    %c0_42 = arith.constant 0 : index
    %c0_43 = arith.constant 0 : index
    %42 = vector.load %arg0[%c3, %c0_42, %c0_43] : memref<8x2x16xf32, #tpu.memory_space<vmem>>, vector<1x2x16xf32>
    %43 = vector.shape_cast %42 : vector<1x2x16xf32> to vector<2x16xf32>
    %c2_44 = arith.constant 2 : index
    %c0_45 = arith.constant 0 : index
    %c0_46 = arith.constant 0 : index
    %44 = vector.load %arg1[%c2_44, %c0_45, %c0_46] : memref<3x16x8xf32, #tpu.memory_space<vmem>>, vector<1x16x8xf32>
    %45 = vector.shape_cast %44 : vector<1x16x8xf32> to vector<16x8xf32>
    %cst_47 = arith.constant dense<0.000000e+00> : vector<2x8xf32>
    %46 = tpu.matmul %43, %45, %cst_47 {dimension_numbers = #tpu.dot_dimension_numbers<[1], [0], [0], [1], [0, 0, 1, 1], [], []>} : vector<2x16xf32>, vector<16x8xf32>, vector<2x8xf32> -> vector<2x8xf32>
    %47 = arith.addf %41, %46 : vector<2x8xf32>
    %cst_48 = arith.constant 0.000000e+00 : f32
    %48 = vector.broadcast %cst_48 : f32 to vector<2x8xf32>
    %49 = arith.maximumf %47, %48 : vector<2x8xf32>
    %c1_49 = arith.constant 1 : index
    %c0_50 = arith.constant 0 : index
    %c0_51 = arith.constant 0 : index
    %50 = vector.load %arg3[%c1_49, %c0_50, %c0_51] : memref<6x8x435xf32, #tpu.memory_space<vmem>>, vector<1x8x435xf32>
    %51 = vector.shape_cast %50 : vector<1x8x435xf32> to vector<8x435xf32>
    %cst_52 = arith.constant dense<0.000000e+00> : vector<2x435xf32>
    %52 = tpu.matmul %49, %51, %cst_52 {dimension_numbers = #tpu.dot_dimension_numbers<[1], [0], [0], [1], [0, 0, 1, 1], [], []>} : vector<2x8xf32>, vector<8x435xf32>, vector<2x435xf32> -> vector<2x435xf32>
    %53 = arith.addf %27, %52 : vector<2x435xf32>
    %c0_53 = arith.constant 0 : index
    %c0_54 = arith.constant 0 : index
    %54 = vector.load %arg2[%c0_53, %c0_54] : memref<1x8xf32, #tpu.memory_space<vmem>>, vector<1x8xf32>
    %c2_55 = arith.constant 2 : index
    %c0_56 = arith.constant 0 : index
    %c0_57 = arith.constant 0 : index
    %55 = vector.load %arg0[%c2_55, %c0_56, %c0_57] : memref<8x2x16xf32, #tpu.memory_space<vmem>>, vector<1x2x16xf32>
    %56 = vector.shape_cast %55 : vector<1x2x16xf32> to vector<2x16xf32>
    %c0_58 = arith.constant 0 : index
    %c0_59 = arith.constant 0 : index
    %c0_60 = arith.constant 0 : index
    %57 = vector.load %arg1[%c0_58, %c0_59, %c0_60] : memref<3x16x8xf32, #tpu.memory_space<vmem>>, vector<1x16x8xf32>
    %58 = vector.shape_cast %57 : vector<1x16x8xf32> to vector<16x8xf32>
    %cst_61 = arith.constant dense<0.000000e+00> : vector<2x8xf32>
    %59 = tpu.matmul %56, %58, %cst_61 {dimension_numbers = #tpu.dot_dimension_numbers<[1], [0], [0], [1], [0, 0, 1, 1], [], []>} : vector<2x16xf32>, vector<16x8xf32>, vector<2x8xf32> -> vector<2x8xf32>
    %60 = vector.broadcast %54 : vector<1x8xf32> to vector<2x8xf32>
    %61 = arith.addf %60, %59 : vector<2x8xf32>
    %c3_62 = arith.constant 3 : index
    %c0_63 = arith.constant 0 : index
    %c0_64 = arith.constant 0 : index
    %62 = vector.load %arg0[%c3_62, %c0_63, %c0_64] : memref<8x2x16xf32, #tpu.memory_space<vmem>>, vector<1x2x16xf32>
    %63 = vector.shape_cast %62 : vector<1x2x16xf32> to vector<2x16xf32>
    %c1_65 = arith.constant 1 : index
    %c0_66 = arith.constant 0 : index
    %c0_67 = arith.constant 0 : index
    %64 = vector.load %arg1[%c1_65, %c0_66, %c0_67] : memref<3x16x8xf32, #tpu.memory_space<vmem>>, vector<1x16x8xf32>
    %65 = vector.shape_cast %64 : vector<1x16x8xf32> to vector<16x8xf32>
    %cst_68 = arith.constant dense<0.000000e+00> : vector<2x8xf32>
    %66 = tpu.matmul %63, %65, %cst_68 {dimension_numbers = #tpu.dot_dimension_numbers<[1], [0], [0], [1], [0, 0, 1, 1], [], []>} : vector<2x16xf32>, vector<16x8xf32>, vector<2x8xf32> -> vector<2x8xf32>
    %67 = arith.addf %61, %66 : vector<2x8xf32>
    %c4 = arith.constant 4 : index
    %c0_69 = arith.constant 0 : index
    %c0_70 = arith.constant 0 : index
    %68 = vector.load %arg0[%c4, %c0_69, %c0_70] : memref<8x2x16xf32, #tpu.memory_space<vmem>>, vector<1x2x16xf32>
    %69 = vector.shape_cast %68 : vector<1x2x16xf32> to vector<2x16xf32>
    %c2_71 = arith.constant 2 : index
    %c0_72 = arith.constant 0 : index
    %c0_73 = arith.constant 0 : index
    %70 = vector.load %arg1[%c2_71, %c0_72, %c0_73] : memref<3x16x8xf32, #tpu.memory_space<vmem>>, vector<1x16x8xf32>
    %71 = vector.shape_cast %70 : vector<1x16x8xf32> to vector<16x8xf32>
    %cst_74 = arith.constant dense<0.000000e+00> : vector<2x8xf32>
    %72 = tpu.matmul %69, %71, %cst_74 {dimension_numbers = #tpu.dot_dimension_numbers<[1], [0], [0], [1], [0, 0, 1, 1], [], []>} : vector<2x16xf32>, vector<16x8xf32>, vector<2x8xf32> -> vector<2x8xf32>
    %73 = arith.addf %67, %72 : vector<2x8xf32>
    %cst_75 = arith.constant 0.000000e+00 : f32
    %74 = vector.broadcast %cst_75 : f32 to vector<2x8xf32>
    %75 = arith.maximumf %73, %74 : vector<2x8xf32>
    %c2_76 = arith.constant 2 : index
    %c0_77 = arith.constant 0 : index
    %c0_78 = arith.constant 0 : index
    %76 = vector.load %arg3[%c2_76, %c0_77, %c0_78] : memref<6x8x435xf32, #tpu.memory_space<vmem>>, vector<1x8x435xf32>
    %77 = vector.shape_cast %76 : vector<1x8x435xf32> to vector<8x435xf32>
    %cst_79 = arith.constant dense<0.000000e+00> : vector<2x435xf32>
    %78 = tpu.matmul %75, %77, %cst_79 {dimension_numbers = #tpu.dot_dimension_numbers<[1], [0], [0], [1], [0, 0, 1, 1], [], []>} : vector<2x8xf32>, vector<8x435xf32>, vector<2x435xf32> -> vector<2x435xf32>
    %79 = arith.addf %53, %78 : vector<2x435xf32>
    %c0_80 = arith.constant 0 : index
    %c0_81 = arith.constant 0 : index
    %80 = vector.load %arg2[%c0_80, %c0_81] : memref<1x8xf32, #tpu.memory_space<vmem>>, vector<1x8xf32>
    %c3_82 = arith.constant 3 : index
    %c0_83 = arith.constant 0 : index
    %c0_84 = arith.constant 0 : index
    %81 = vector.load %arg0[%c3_82, %c0_83, %c0_84] : memref<8x2x16xf32, #tpu.memory_space<vmem>>, vector<1x2x16xf32>
    %82 = vector.shape_cast %81 : vector<1x2x16xf32> to vector<2x16xf32>
    %c0_85 = arith.constant 0 : index
    %c0_86 = arith.constant 0 : index
    %c0_87 = arith.constant 0 : index
    %83 = vector.load %arg1[%c0_85, %c0_86, %c0_87] : memref<3x16x8xf32, #tpu.memory_space<vmem>>, vector<1x16x8xf32>
    %84 = vector.shape_cast %83 : vector<1x16x8xf32> to vector<16x8xf32>
    %cst_88 = arith.constant dense<0.000000e+00> : vector<2x8xf32>
    %85 = tpu.matmul %82, %84, %cst_88 {dimension_numbers = #tpu.dot_dimension_numbers<[1], [0], [0], [1], [0, 0, 1, 1], [], []>} : vector<2x16xf32>, vector<16x8xf32>, vector<2x8xf32> -> vector<2x8xf32>
    %86 = vector.broadcast %80 : vector<1x8xf32> to vector<2x8xf32>
    %87 = arith.addf %86, %85 : vector<2x8xf32>
    %c4_89 = arith.constant 4 : index
    %c0_90 = arith.constant 0 : index
    %c0_91 = arith.constant 0 : index
    %88 = vector.load %arg0[%c4_89, %c0_90, %c0_91] : memref<8x2x16xf32, #tpu.memory_space<vmem>>, vector<1x2x16xf32>
    %89 = vector.shape_cast %88 : vector<1x2x16xf32> to vector<2x16xf32>
    %c1_92 = arith.constant 1 : index
    %c0_93 = arith.constant 0 : index
    %c0_94 = arith.constant 0 : index
    %90 = vector.load %arg1[%c1_92, %c0_93, %c0_94] : memref<3x16x8xf32, #tpu.memory_space<vmem>>, vector<1x16x8xf32>
    %91 = vector.shape_cast %90 : vector<1x16x8xf32> to vector<16x8xf32>
    %cst_95 = arith.constant dense<0.000000e+00> : vector<2x8xf32>
    %92 = tpu.matmul %89, %91, %cst_95 {dimension_numbers = #tpu.dot_dimension_numbers<[1], [0], [0], [1], [0, 0, 1, 1], [], []>} : vector<2x16xf32>, vector<16x8xf32>, vector<2x8xf32> -> vector<2x8xf32>
    %93 = arith.addf %87, %92 : vector<2x8xf32>
    %c5 = arith.constant 5 : index
    %c0_96 = arith.constant 0 : index
    %c0_97 = arith.constant 0 : index
    %94 = vector.load %arg0[%c5, %c0_96, %c0_97] : memref<8x2x16xf32, #tpu.memory_space<vmem>>, vector<1x2x16xf32>
    %95 = vector.shape_cast %94 : vector<1x2x16xf32> to vector<2x16xf32>
    %c2_98 = arith.constant 2 : index
    %c0_99 = arith.constant 0 : index
    %c0_100 = arith.constant 0 : index
    %96 = vector.load %arg1[%c2_98, %c0_99, %c0_100] : memref<3x16x8xf32, #tpu.memory_space<vmem>>, vector<1x16x8xf32>
    %97 = vector.shape_cast %96 : vector<1x16x8xf32> to vector<16x8xf32>
    %cst_101 = arith.constant dense<0.000000e+00> : vector<2x8xf32>
    %98 = tpu.matmul %95, %97, %cst_101 {dimension_numbers = #tpu.dot_dimension_numbers<[1], [0], [0], [1], [0, 0, 1, 1], [], []>} : vector<2x16xf32>, vector<16x8xf32>, vector<2x8xf32> -> vector<2x8xf32>
    %99 = arith.addf %93, %98 : vector<2x8xf32>
    %cst_102 = arith.constant 0.000000e+00 : f32
    %100 = vector.broadcast %cst_102 : f32 to vector<2x8xf32>
    %101 = arith.maximumf %99, %100 : vector<2x8xf32>
    %c3_103 = arith.constant 3 : index
    %c0_104 = arith.constant 0 : index
    %c0_105 = arith.constant 0 : index
    %102 = vector.load %arg3[%c3_103, %c0_104, %c0_105] : memref<6x8x435xf32, #tpu.memory_space<vmem>>, vector<1x8x435xf32>
    %103 = vector.shape_cast %102 : vector<1x8x435xf32> to vector<8x435xf32>
    %cst_106 = arith.constant dense<0.000000e+00> : vector<2x435xf32>
    %104 = tpu.matmul %101, %103, %cst_106 {dimension_numbers = #tpu.dot_dimension_numbers<[1], [0], [0], [1], [0, 0, 1, 1], [], []>} : vector<2x8xf32>, vector<8x435xf32>, vector<2x435xf32> -> vector<2x435xf32>
    %105 = arith.addf %79, %104 : vector<2x435xf32>
    %c0_107 = arith.constant 0 : index
    %c0_108 = arith.constant 0 : index
    %106 = vector.load %arg2[%c0_107, %c0_108] : memref<1x8xf32, #tpu.memory_space<vmem>>, vector<1x8xf32>
    %c4_109 = arith.constant 4 : index
    %c0_110 = arith.constant 0 : index
    %c0_111 = arith.constant 0 : index
    %107 = vector.load %arg0[%c4_109, %c0_110, %c0_111] : memref<8x2x16xf32, #tpu.memory_space<vmem>>, vector<1x2x16xf32>
    %108 = vector.shape_cast %107 : vector<1x2x16xf32> to vector<2x16xf32>
    %c0_112 = arith.constant 0 : index
    %c0_113 = arith.constant 0 : index
    %c0_114 = arith.constant 0 : index
    %109 = vector.load %arg1[%c0_112, %c0_113, %c0_114] : memref<3x16x8xf32, #tpu.memory_space<vmem>>, vector<1x16x8xf32>
    %110 = vector.shape_cast %109 : vector<1x16x8xf32> to vector<16x8xf32>
    %cst_115 = arith.constant dense<0.000000e+00> : vector<2x8xf32>
    %111 = tpu.matmul %108, %110, %cst_115 {dimension_numbers = #tpu.dot_dimension_numbers<[1], [0], [0], [1], [0, 0, 1, 1], [], []>} : vector<2x16xf32>, vector<16x8xf32>, vector<2x8xf32> -> vector<2x8xf32>
    %112 = vector.broadcast %106 : vector<1x8xf32> to vector<2x8xf32>
    %113 = arith.addf %112, %111 : vector<2x8xf32>
    %c5_116 = arith.constant 5 : index
    %c0_117 = arith.constant 0 : index
    %c0_118 = arith.constant 0 : index
    %114 = vector.load %arg0[%c5_116, %c0_117, %c0_118] : memref<8x2x16xf32, #tpu.memory_space<vmem>>, vector<1x2x16xf32>
    %115 = vector.shape_cast %114 : vector<1x2x16xf32> to vector<2x16xf32>
    %c1_119 = arith.constant 1 : index
    %c0_120 = arith.constant 0 : index
    %c0_121 = arith.constant 0 : index
    %116 = vector.load %arg1[%c1_119, %c0_120, %c0_121] : memref<3x16x8xf32, #tpu.memory_space<vmem>>, vector<1x16x8xf32>
    %117 = vector.shape_cast %116 : vector<1x16x8xf32> to vector<16x8xf32>
    %cst_122 = arith.constant dense<0.000000e+00> : vector<2x8xf32>
    %118 = tpu.matmul %115, %117, %cst_122 {dimension_numbers = #tpu.dot_dimension_numbers<[1], [0], [0], [1], [0, 0, 1, 1], [], []>} : vector<2x16xf32>, vector<16x8xf32>, vector<2x8xf32> -> vector<2x8xf32>
    %119 = arith.addf %113, %118 : vector<2x8xf32>
    %c6 = arith.constant 6 : index
    %c0_123 = arith.constant 0 : index
    %c0_124 = arith.constant 0 : index
    %120 = vector.load %arg0[%c6, %c0_123, %c0_124] : memref<8x2x16xf32, #tpu.memory_space<vmem>>, vector<1x2x16xf32>
    %121 = vector.shape_cast %120 : vector<1x2x16xf32> to vector<2x16xf32>
    %c2_125 = arith.constant 2 : index
    %c0_126 = arith.constant 0 : index
    %c0_127 = arith.constant 0 : index
    %122 = vector.load %arg1[%c2_125, %c0_126, %c0_127] : memref<3x16x8xf32, #tpu.memory_space<vmem>>, vector<1x16x8xf32>
    %123 = vector.shape_cast %122 : vector<1x16x8xf32> to vector<16x8xf32>
    %cst_128 = arith.constant dense<0.000000e+00> : vector<2x8xf32>
    %124 = tpu.matmul %121, %123, %cst_128 {dimension_numbers = #tpu.dot_dimension_numbers<[1], [0], [0], [1], [0, 0, 1, 1], [], []>} : vector<2x16xf32>, vector<16x8xf32>, vector<2x8xf32> -> vector<2x8xf32>
    %125 = arith.addf %119, %124 : vector<2x8xf32>
    %cst_129 = arith.constant 0.000000e+00 : f32
    %126 = vector.broadcast %cst_129 : f32 to vector<2x8xf32>
    %127 = arith.maximumf %125, %126 : vector<2x8xf32>
    %c4_130 = arith.constant 4 : index
    %c0_131 = arith.constant 0 : index
    %c0_132 = arith.constant 0 : index
    %128 = vector.load %arg3[%c4_130, %c0_131, %c0_132] : memref<6x8x435xf32, #tpu.memory_space<vmem>>, vector<1x8x435xf32>
    %129 = vector.shape_cast %128 : vector<1x8x435xf32> to vector<8x435xf32>
    %cst_133 = arith.constant dense<0.000000e+00> : vector<2x435xf32>
    %130 = tpu.matmul %127, %129, %cst_133 {dimension_numbers = #tpu.dot_dimension_numbers<[1], [0], [0], [1], [0, 0, 1, 1], [], []>} : vector<2x8xf32>, vector<8x435xf32>, vector<2x435xf32> -> vector<2x435xf32>
    %131 = arith.addf %105, %130 : vector<2x435xf32>
    %c0_134 = arith.constant 0 : index
    %c0_135 = arith.constant 0 : index
    %132 = vector.load %arg2[%c0_134, %c0_135] : memref<1x8xf32, #tpu.memory_space<vmem>>, vector<1x8xf32>
    %c5_136 = arith.constant 5 : index
    %c0_137 = arith.constant 0 : index
    %c0_138 = arith.constant 0 : index
    %133 = vector.load %arg0[%c5_136, %c0_137, %c0_138] : memref<8x2x16xf32, #tpu.memory_space<vmem>>, vector<1x2x16xf32>
    %134 = vector.shape_cast %133 : vector<1x2x16xf32> to vector<2x16xf32>
    %c0_139 = arith.constant 0 : index
    %c0_140 = arith.constant 0 : index
    %c0_141 = arith.constant 0 : index
    %135 = vector.load %arg1[%c0_139, %c0_140, %c0_141] : memref<3x16x8xf32, #tpu.memory_space<vmem>>, vector<1x16x8xf32>
    %136 = vector.shape_cast %135 : vector<1x16x8xf32> to vector<16x8xf32>
    %cst_142 = arith.constant dense<0.000000e+00> : vector<2x8xf32>
    %137 = tpu.matmul %134, %136, %cst_142 {dimension_numbers = #tpu.dot_dimension_numbers<[1], [0], [0], [1], [0, 0, 1, 1], [], []>} : vector<2x16xf32>, vector<16x8xf32>, vector<2x8xf32> -> vector<2x8xf32>
    %138 = vector.broadcast %132 : vector<1x8xf32> to vector<2x8xf32>
    %139 = arith.addf %138, %137 : vector<2x8xf32>
    %c6_143 = arith.constant 6 : index
    %c0_144 = arith.constant 0 : index
    %c0_145 = arith.constant 0 : index
    %140 = vector.load %arg0[%c6_143, %c0_144, %c0_145] : memref<8x2x16xf32, #tpu.memory_space<vmem>>, vector<1x2x16xf32>
    %141 = vector.shape_cast %140 : vector<1x2x16xf32> to vector<2x16xf32>
    %c1_146 = arith.constant 1 : index
    %c0_147 = arith.constant 0 : index
    %c0_148 = arith.constant 0 : index
    %142 = vector.load %arg1[%c1_146, %c0_147, %c0_148] : memref<3x16x8xf32, #tpu.memory_space<vmem>>, vector<1x16x8xf32>
    %143 = vector.shape_cast %142 : vector<1x16x8xf32> to vector<16x8xf32>
    %cst_149 = arith.constant dense<0.000000e+00> : vector<2x8xf32>
    %144 = tpu.matmul %141, %143, %cst_149 {dimension_numbers = #tpu.dot_dimension_numbers<[1], [0], [0], [1], [0, 0, 1, 1], [], []>} : vector<2x16xf32>, vector<16x8xf32>, vector<2x8xf32> -> vector<2x8xf32>
    %145 = arith.addf %139, %144 : vector<2x8xf32>
    %c7 = arith.constant 7 : index
    %c0_150 = arith.constant 0 : index
    %c0_151 = arith.constant 0 : index
    %146 = vector.load %arg0[%c7, %c0_150, %c0_151] : memref<8x2x16xf32, #tpu.memory_space<vmem>>, vector<1x2x16xf32>
    %147 = vector.shape_cast %146 : vector<1x2x16xf32> to vector<2x16xf32>
    %c2_152 = arith.constant 2 : index
    %c0_153 = arith.constant 0 : index
    %c0_154 = arith.constant 0 : index
    %148 = vector.load %arg1[%c2_152, %c0_153, %c0_154] : memref<3x16x8xf32, #tpu.memory_space<vmem>>, vector<1x16x8xf32>
    %149 = vector.shape_cast %148 : vector<1x16x8xf32> to vector<16x8xf32>
    %cst_155 = arith.constant dense<0.000000e+00> : vector<2x8xf32>
    %150 = tpu.matmul %147, %149, %cst_155 {dimension_numbers = #tpu.dot_dimension_numbers<[1], [0], [0], [1], [0, 0, 1, 1], [], []>} : vector<2x16xf32>, vector<16x8xf32>, vector<2x8xf32> -> vector<2x8xf32>
    %151 = arith.addf %145, %150 : vector<2x8xf32>
    %cst_156 = arith.constant 0.000000e+00 : f32
    %152 = vector.broadcast %cst_156 : f32 to vector<2x8xf32>
    %153 = arith.maximumf %151, %152 : vector<2x8xf32>
    %c5_157 = arith.constant 5 : index
    %c0_158 = arith.constant 0 : index
    %c0_159 = arith.constant 0 : index
    %154 = vector.load %arg3[%c5_157, %c0_158, %c0_159] : memref<6x8x435xf32, #tpu.memory_space<vmem>>, vector<1x8x435xf32>
    %155 = vector.shape_cast %154 : vector<1x8x435xf32> to vector<8x435xf32>
    %cst_160 = arith.constant dense<0.000000e+00> : vector<2x435xf32>
    %156 = tpu.matmul %153, %155, %cst_160 {dimension_numbers = #tpu.dot_dimension_numbers<[1], [0], [0], [1], [0, 0, 1, 1], [], []>} : vector<2x8xf32>, vector<8x435xf32>, vector<2x435xf32> -> vector<2x435xf32>
    %157 = arith.addf %131, %156 : vector<2x435xf32>
    %cst_161 = arith.constant 0.000000e+00 : f32
    %158 = vector.broadcast %cst_161 : f32 to vector<2x435xf32>
    %159 = arith.maximumf %157, %158 : vector<2x435xf32>
    %c0_162 = arith.constant 0 : index
    %c0_163 = arith.constant 0 : index
    %160 = vector.load %arg5[%c0_162, %c0_163] : memref<435x32xf32, #tpu.memory_space<vmem>>, vector<435x32xf32>
    %cst_164 = arith.constant dense<0.000000e+00> : vector<2x32xf32>
    %161 = tpu.matmul %159, %160, %cst_164 {dimension_numbers = #tpu.dot_dimension_numbers<[1], [0], [0], [1], [0, 0, 1, 1], [], []>} : vector<2x435xf32>, vector<435x32xf32>, vector<2x32xf32> -> vector<2x32xf32>
    %c0_165 = arith.constant 0 : index
    %c0_166 = arith.constant 0 : index
    %162 = vector.load %arg6[%c0_165, %c0_166] : memref<1x32xf32, #tpu.memory_space<vmem>>, vector<1x32xf32>
    %163 = vector.broadcast %162 : vector<1x32xf32> to vector<2x32xf32>
    %164 = arith.addf %161, %163 : vector<2x32xf32>
    %c0_167 = arith.constant 0 : index
    %c0_168 = arith.constant 0 : index
    %165 = vector.load %arg7[%c0_167, %c0_168] : memref<435x32xf32, #tpu.memory_space<vmem>>, vector<435x32xf32>
    %cst_169 = arith.constant dense<0.000000e+00> : vector<2x32xf32>
    %166 = tpu.matmul %159, %165, %cst_169 {dimension_numbers = #tpu.dot_dimension_numbers<[1], [0], [0], [1], [0, 0, 1, 1], [], []>} : vector<2x435xf32>, vector<435x32xf32>, vector<2x32xf32> -> vector<2x32xf32>
    %c0_170 = arith.constant 0 : index
    %c0_171 = arith.constant 0 : index
    %167 = vector.load %arg8[%c0_170, %c0_171] : memref<1x32xf32, #tpu.memory_space<vmem>>, vector<1x32xf32>
    %168 = vector.broadcast %167 : vector<1x32xf32> to vector<2x32xf32>
    %169 = arith.addf %166, %168 : vector<2x32xf32>
    %cst_172 = arith.constant 5.000000e-01 : f32
    %170 = vector.broadcast %cst_172 : f32 to vector<2x32xf32>
    %171 = arith.mulf %170, %169 : vector<2x32xf32>
    %172 = math.exp %171 : vector<2x32xf32>
    %c0_173 = arith.constant 0 : index
    %c0_174 = arith.constant 0 : index
    %173 = vector.load %arg17[%c0_173, %c0_174] : memref<2x32xf32, #tpu.memory_space<vmem>>, vector<2x32xf32>
    tpu.vector_store %arg17[%c0_173, %c0_174], %164 {strides = array<i32>} : memref<2x32xf32, #tpu.memory_space<vmem>>, vector<2x32xf32>,
    %c0_175 = arith.constant 0 : index
    %c0_176 = arith.constant 0 : index
    %174 = vector.load %arg18[%c0_175, %c0_176] : memref<2x32xf32, #tpu.memory_space<vmem>>, vector<2x32xf32>
    tpu.vector_store %arg18[%c0_175, %c0_176], %172 {strides = array<i32>} : memref<2x32xf32, #tpu.memory_space<vmem>>, vector<2x32xf32>,
    %c0_177 = arith.constant 0 : index
    %c0_178 = arith.constant 0 : index
    %175 = vector.load %arg9[%c0_177, %c0_178] : memref<2x32xf32, #tpu.memory_space<vmem>>, vector<2x32xf32>
    %176 = arith.mulf %172, %175 : vector<2x32xf32>
    %177 = arith.addf %164, %176 : vector<2x32xf32>
    %178 = tpu.iota {dimensions = array<i32: 1>} : vector<1x16xi32>
    %c2_i32 = arith.constant 2 : i32
    %179 = vector.broadcast %c2_i32 : i32 to vector<1x16xi32>
    %180 = arith.cmpi eq, %178, %179 : vector<1x16xi32>
    %181 = arith.extui %180 : vector<1x16xi1> to vector<1x16xi32>
    %182 = arith.sitofp %181 : vector<1x16xi32> to vector<1x16xf32>
    %c0_179 = arith.constant 0 : index
    %c0_180 = arith.constant 0 : index
    %183 = vector.load %arg10[%c0_179, %c0_180] : memref<16x96xf32, #tpu.memory_space<vmem>>, vector<16x96xf32>
    %cst_181 = arith.constant dense<0.000000e+00> : vector<1x96xf32>
    %184 = tpu.matmul %182, %183, %cst_181 {dimension_numbers = #tpu.dot_dimension_numbers<[1], [0], [0], [1], [0, 0, 1, 1], [], []>} : vector<1x16xf32>, vector<16x96xf32>, vector<1x96xf32> -> vector<1x96xf32>
    %c0_182 = arith.constant 0 : index
    %c0_183 = arith.constant 0 : index
    %185 = vector.load %arg11[%c0_182, %c0_183] : memref<1x96xf32, #tpu.memory_space<vmem>>, vector<1x96xf32>
    %186 = arith.addf %184, %185 : vector<1x96xf32>
    %c0_184 = arith.constant 0 : index
    %c0_185 = arith.constant 0 : index
    %187 = vector.load %arg12[%c0_184, %c0_185] : memref<32x96xf32, #tpu.memory_space<vmem>>, vector<32x96xf32>
    %cst_186 = arith.constant dense<0.000000e+00> : vector<2x96xf32>
    %188 = tpu.matmul %177, %187, %cst_186 {dimension_numbers = #tpu.dot_dimension_numbers<[1], [0], [0], [1], [0, 0, 1, 1], [], []>} : vector<2x32xf32>, vector<32x96xf32>, vector<2x96xf32> -> vector<2x96xf32>
    %c0_187 = arith.constant 0 : index
    %c0_188 = arith.constant 0 : index
    %189 = vector.load %arg13[%c0_187, %c0_188] : memref<1x96xf32, #tpu.memory_space<vmem>>, vector<1x96xf32>
    %190 = vector.broadcast %189 : vector<1x96xf32> to vector<2x96xf32>
    %191 = arith.addf %188, %190 : vector<2x96xf32>
    %192 = vector.extract_strided_slice %186 {offsets = [0, 0], sizes = [1, 32], strides = [1, 1]} : vector<1x96xf32> to vector<1x32xf32>
    %193 = vector.extract_strided_slice %191 {offsets = [0, 0], sizes = [2, 32], strides = [1, 1]} : vector<2x96xf32> to vector<2x32xf32>
    %194 = vector.broadcast %192 : vector<1x32xf32> to vector<2x32xf32>
    %195 = arith.addf %194, %193 : vector<2x32xf32>
    %196 = arith.negf %195 : vector<2x32xf32>
    %197 = math.exp %196 : vector<2x32xf32>
    %cst_189 = arith.constant 1.000000e+00 : f32
    %198 = vector.broadcast %cst_189 : f32 to vector<2x32xf32>
    %199 = arith.addf %198, %197 : vector<2x32xf32>
    %200 = arith.divf %198, %199 : vector<2x32xf32>
    %201 = vector.extract_strided_slice %186 {offsets = [0, 32], sizes = [1, 32], strides = [1, 1]} : vector<1x96xf32> to vector<1x32xf32>
    %202 = vector.extract_strided_slice %191 {offsets = [0, 32], sizes = [2, 32], strides = [1, 1]} : vector<2x96xf32> to vector<2x32xf32>
    %203 = vector.broadcast %201 : vector<1x32xf32> to vector<2x32xf32>
    %204 = arith.addf %203, %202 : vector<2x32xf32>
    %205 = arith.negf %204 : vector<2x32xf32>
    %206 = math.exp %205 : vector<2x32xf32>
    %cst_190 = arith.constant 1.000000e+00 : f32
    %207 = vector.broadcast %cst_190 : f32 to vector<2x32xf32>
    %208 = arith.addf %207, %206 : vector<2x32xf32>
    %209 = arith.divf %207, %208 : vector<2x32xf32>
    %210 = vector.extract_strided_slice %186 {offsets = [0, 64], sizes = [1, 32], strides = [1, 1]} : vector<1x96xf32> to vector<1x32xf32>
    %211 = vector.extract_strided_slice %191 {offsets = [0, 64], sizes = [2, 32], strides = [1, 1]} : vector<2x96xf32> to vector<2x32xf32>
    %212 = arith.mulf %200, %211 : vector<2x32xf32>
    %213 = vector.broadcast %210 : vector<1x32xf32> to vector<2x32xf32>
    %214 = arith.addf %213, %212 : vector<2x32xf32>
    %215 = math.tanh %214 : vector<2x32xf32>
    %cst_191 = arith.constant 1.000000e+00 : f32
    %216 = vector.broadcast %cst_191 : f32 to vector<2x32xf32>
    %217 = arith.subf %216, %209 : vector<2x32xf32>
    %218 = arith.mulf %217, %215 : vector<2x32xf32>
    %219 = arith.mulf %209, %177 : vector<2x32xf32>
    %220 = arith.addf %218, %219 : vector<2x32xf32>
    %c0_192 = arith.constant 0 : index
    %c0_193 = arith.constant 0 : index
    %221 = vector.load %arg19[%c0_192, %c0_193] : memref<16x32xf32, #tpu.memory_space<vmem>>, vector<2x32xf32>
    tpu.vector_store %arg19[%c0_192, %c0_193], %220 {strides = array<i32>} : memref<16x32xf32, #tpu.memory_space<vmem>>, vector<2x32xf32>,
    %c0_194 = arith.constant 0 : index
    %c0_195 = arith.constant 0 : index
    %c0_196 = arith.constant 0 : index
    %222 = vector.load %arg0[%c0_194, %c0_195, %c0_196] : memref<8x2x16xf32, #tpu.memory_space<vmem>>, vector<1x2x16xf32>
    %223 = vector.shape_cast %222 : vector<1x2x16xf32> to vector<2x16xf32>
    %c0_197 = arith.constant 0 : index
    %c0_198 = arith.constant 0 : index
    %224 = vector.load %arg10[%c0_197, %c0_198] : memref<16x96xf32, #tpu.memory_space<vmem>>, vector<16x96xf32>
    %cst_199 = arith.constant dense<0.000000e+00> : vector<2x96xf32>
    %225 = tpu.matmul %223, %224, %cst_199 {dimension_numbers = #tpu.dot_dimension_numbers<[1], [0], [0], [1], [0, 0, 1, 1], [], []>} : vector<2x16xf32>, vector<16x96xf32>, vector<2x96xf32> -> vector<2x96xf32>
    %c0_200 = arith.constant 0 : index
    %c0_201 = arith.constant 0 : index
    %226 = vector.load %arg11[%c0_200, %c0_201] : memref<1x96xf32, #tpu.memory_space<vmem>>, vector<1x96xf32>
    %227 = vector.broadcast %226 : vector<1x96xf32> to vector<2x96xf32>
    %228 = arith.addf %225, %227 : vector<2x96xf32>
    %c0_202 = arith.constant 0 : index
    %c0_203 = arith.constant 0 : index
    %229 = vector.load %arg12[%c0_202, %c0_203] : memref<32x96xf32, #tpu.memory_space<vmem>>, vector<32x96xf32>
    %cst_204 = arith.constant dense<0.000000e+00> : vector<2x96xf32>
    %230 = tpu.matmul %220, %229, %cst_204 {dimension_numbers = #tpu.dot_dimension_numbers<[1], [0], [0], [1], [0, 0, 1, 1], [], []>} : vector<2x32xf32>, vector<32x96xf32>, vector<2x96xf32> -> vector<2x96xf32>
    %c0_205 = arith.constant 0 : index
    %c0_206 = arith.constant 0 : index
    %231 = vector.load %arg13[%c0_205, %c0_206] : memref<1x96xf32, #tpu.memory_space<vmem>>, vector<1x96xf32>
    %232 = vector.broadcast %231 : vector<1x96xf32> to vector<2x96xf32>
    %233 = arith.addf %230, %232 : vector<2x96xf32>
    %234 = vector.extract_strided_slice %228 {offsets = [0, 0], sizes = [2, 32], strides = [1, 1]} : vector<2x96xf32> to vector<2x32xf32>
    %235 = vector.extract_strided_slice %233 {offsets = [0, 0], sizes = [2, 32], strides = [1, 1]} : vector<2x96xf32> to vector<2x32xf32>
    %236 = arith.addf %234, %235 : vector<2x32xf32>
    %237 = arith.negf %236 : vector<2x32xf32>
    %238 = math.exp %237 : vector<2x32xf32>
    %cst_207 = arith.constant 1.000000e+00 : f32
    %239 = vector.broadcast %cst_207 : f32 to vector<2x32xf32>
    %240 = arith.addf %239, %238 : vector<2x32xf32>
    %241 = arith.divf %239, %240 : vector<2x32xf32>
    %242 = vector.extract_strided_slice %228 {offsets = [0, 32], sizes = [2, 32], strides = [1, 1]} : vector<2x96xf32> to vector<2x32xf32>
    %243 = vector.extract_strided_slice %233 {offsets = [0, 32], sizes = [2, 32], strides = [1, 1]} : vector<2x96xf32> to vector<2x32xf32>
    %244 = arith.addf %242, %243 : vector<2x32xf32>
    %245 = arith.negf %244 : vector<2x32xf32>
    %246 = math.exp %245 : vector<2x32xf32>
    %cst_208 = arith.constant 1.000000e+00 : f32
    %247 = vector.broadcast %cst_208 : f32 to vector<2x32xf32>
    %248 = arith.addf %247, %246 : vector<2x32xf32>
    %249 = arith.divf %247, %248 : vector<2x32xf32>
    %250 = vector.extract_strided_slice %228 {offsets = [0, 64], sizes = [2, 32], strides = [1, 1]} : vector<2x96xf32> to vector<2x32xf32>
    %251 = vector.extract_strided_slice %233 {offsets = [0, 64], sizes = [2, 32], strides = [1, 1]} : vector<2x96xf32> to vector<2x32xf32>
    %252 = arith.mulf %241, %251 : vector<2x32xf32>
    %253 = arith.addf %250, %252 : vector<2x32xf32>
    %254 = math.tanh %253 : vector<2x32xf32>
    %cst_209 = arith.constant 1.000000e+00 : f32
    %255 = vector.broadcast %cst_209 : f32 to vector<2x32xf32>
    %256 = arith.subf %255, %249 : vector<2x32xf32>
    %257 = arith.mulf %256, %254 : vector<2x32xf32>
    %258 = arith.mulf %249, %220 : vector<2x32xf32>
    %259 = arith.addf %257, %258 : vector<2x32xf32>
    %c2_210 = arith.constant 2 : index
    %c0_211 = arith.constant 0 : index
    %260 = vector.load %arg19[%c2_210, %c0_211] : memref<16x32xf32, #tpu.memory_space<vmem>>, vector<2x32xf32>
    tpu.vector_store %arg19[%c2_210, %c0_211], %259 {strides = array<i32>} : memref<16x32xf32, #tpu.memory_space<vmem>>, vector<2x32xf32>,
    %c1_212 = arith.constant 1 : index
    %c0_213 = arith.constant 0 : index
    %c0_214 = arith.constant 0 : index
    %261 = vector.load %arg0[%c1_212, %c0_213, %c0_214] : memref<8x2x16xf32, #tpu.memory_space<vmem>>, vector<1x2x16xf32>
    %262 = vector.shape_cast %261 : vector<1x2x16xf32> to vector<2x16xf32>
    %c0_215 = arith.constant 0 : index
    %c0_216 = arith.constant 0 : index
    %263 = vector.load %arg10[%c0_215, %c0_216] : memref<16x96xf32, #tpu.memory_space<vmem>>, vector<16x96xf32>
    %cst_217 = arith.constant dense<0.000000e+00> : vector<2x96xf32>
    %264 = tpu.matmul %262, %263, %cst_217 {dimension_numbers = #tpu.dot_dimension_numbers<[1], [0], [0], [1], [0, 0, 1, 1], [], []>} : vector<2x16xf32>, vector<16x96xf32>, vector<2x96xf32> -> vector<2x96xf32>
    %c0_218 = arith.constant 0 : index
    %c0_219 = arith.constant 0 : index
    %265 = vector.load %arg11[%c0_218, %c0_219] : memref<1x96xf32, #tpu.memory_space<vmem>>, vector<1x96xf32>
    %266 = vector.broadcast %265 : vector<1x96xf32> to vector<2x96xf32>
    %267 = arith.addf %264, %266 : vector<2x96xf32>
    %c0_220 = arith.constant 0 : index
    %c0_221 = arith.constant 0 : index
    %268 = vector.load %arg12[%c0_220, %c0_221] : memref<32x96xf32, #tpu.memory_space<vmem>>, vector<32x96xf32>
    %cst_222 = arith.constant dense<0.000000e+00> : vector<2x96xf32>
    %269 = tpu.matmul %259, %268, %cst_222 {dimension_numbers = #tpu.dot_dimension_numbers<[1], [0], [0], [1], [0, 0, 1, 1], [], []>} : vector<2x32xf32>, vector<32x96xf32>, vector<2x96xf32> -> vector<2x96xf32>
    %c0_223 = arith.constant 0 : index
    %c0_224 = arith.constant 0 : index
    %270 = vector.load %arg13[%c0_223, %c0_224] : memref<1x96xf32, #tpu.memory_space<vmem>>, vector<1x96xf32>
    %271 = vector.broadcast %270 : vector<1x96xf32> to vector<2x96xf32>
    %272 = arith.addf %269, %271 : vector<2x96xf32>
    %273 = vector.extract_strided_slice %267 {offsets = [0, 0], sizes = [2, 32], strides = [1, 1]} : vector<2x96xf32> to vector<2x32xf32>
    %274 = vector.extract_strided_slice %272 {offsets = [0, 0], sizes = [2, 32], strides = [1, 1]} : vector<2x96xf32> to vector<2x32xf32>
    %275 = arith.addf %273, %274 : vector<2x32xf32>
    %276 = arith.negf %275 : vector<2x32xf32>
    %277 = math.exp %276 : vector<2x32xf32>
    %cst_225 = arith.constant 1.000000e+00 : f32
    %278 = vector.broadcast %cst_225 : f32 to vector<2x32xf32>
    %279 = arith.addf %278, %277 : vector<2x32xf32>
    %280 = arith.divf %278, %279 : vector<2x32xf32>
    %281 = vector.extract_strided_slice %267 {offsets = [0, 32], sizes = [2, 32], strides = [1, 1]} : vector<2x96xf32> to vector<2x32xf32>
    %282 = vector.extract_strided_slice %272 {offsets = [0, 32], sizes = [2, 32], strides = [1, 1]} : vector<2x96xf32> to vector<2x32xf32>
    %283 = arith.addf %281, %282 : vector<2x32xf32>
    %284 = arith.negf %283 : vector<2x32xf32>
    %285 = math.exp %284 : vector<2x32xf32>
    %cst_226 = arith.constant 1.000000e+00 : f32
    %286 = vector.broadcast %cst_226 : f32 to vector<2x32xf32>
    %287 = arith.addf %286, %285 : vector<2x32xf32>
    %288 = arith.divf %286, %287 : vector<2x32xf32>
    %289 = vector.extract_strided_slice %267 {offsets = [0, 64], sizes = [2, 32], strides = [1, 1]} : vector<2x96xf32> to vector<2x32xf32>
    %290 = vector.extract_strided_slice %272 {offsets = [0, 64], sizes = [2, 32], strides = [1, 1]} : vector<2x96xf32> to vector<2x32xf32>
    %291 = arith.mulf %280, %290 : vector<2x32xf32>
    %292 = arith.addf %289, %291 : vector<2x32xf32>
    %293 = math.tanh %292 : vector<2x32xf32>
    %cst_227 = arith.constant 1.000000e+00 : f32
    %294 = vector.broadcast %cst_227 : f32 to vector<2x32xf32>
    %295 = arith.subf %294, %288 : vector<2x32xf32>
    %296 = arith.mulf %295, %293 : vector<2x32xf32>
    %297 = arith.mulf %288, %259 : vector<2x32xf32>
    %298 = arith.addf %296, %297 : vector<2x32xf32>
    %c4_228 = arith.constant 4 : index
    %c0_229 = arith.constant 0 : index
    %299 = vector.load %arg19[%c4_228, %c0_229] : memref<16x32xf32, #tpu.memory_space<vmem>>, vector<2x32xf32>
    tpu.vector_store %arg19[%c4_228, %c0_229], %298 {strides = array<i32>} : memref<16x32xf32, #tpu.memory_space<vmem>>, vector<2x32xf32>,
    %c2_230 = arith.constant 2 : index
    %c0_231 = arith.constant 0 : index
    %c0_232 = arith.constant 0 : index
    %300 = vector.load %arg0[%c2_230, %c0_231, %c0_232] : memref<8x2x16xf32, #tpu.memory_space<vmem>>, vector<1x2x16xf32>
    %301 = vector.shape_cast %300 : vector<1x2x16xf32> to vector<2x16xf32>
    %c0_233 = arith.constant 0 : index
    %c0_234 = arith.constant 0 : index
    %302 = vector.load %arg10[%c0_233, %c0_234] : memref<16x96xf32, #tpu.memory_space<vmem>>, vector<16x96xf32>
    %cst_235 = arith.constant dense<0.000000e+00> : vector<2x96xf32>
    %303 = tpu.matmul %301, %302, %cst_235 {dimension_numbers = #tpu.dot_dimension_numbers<[1], [0], [0], [1], [0, 0, 1, 1], [], []>} : vector<2x16xf32>, vector<16x96xf32>, vector<2x96xf32> -> vector<2x96xf32>
    %c0_236 = arith.constant 0 : index
    %c0_237 = arith.constant 0 : index
    %304 = vector.load %arg11[%c0_236, %c0_237] : memref<1x96xf32, #tpu.memory_space<vmem>>, vector<1x96xf32>
    %305 = vector.broadcast %304 : vector<1x96xf32> to vector<2x96xf32>
    %306 = arith.addf %303, %305 : vector<2x96xf32>
    %c0_238 = arith.constant 0 : index
    %c0_239 = arith.constant 0 : index
    %307 = vector.load %arg12[%c0_238, %c0_239] : memref<32x96xf32, #tpu.memory_space<vmem>>, vector<32x96xf32>
    %cst_240 = arith.constant dense<0.000000e+00> : vector<2x96xf32>
    %308 = tpu.matmul %298, %307, %cst_240 {dimension_numbers = #tpu.dot_dimension_numbers<[1], [0], [0], [1], [0, 0, 1, 1], [], []>} : vector<2x32xf32>, vector<32x96xf32>, vector<2x96xf32> -> vector<2x96xf32>
    %c0_241 = arith.constant 0 : index
    %c0_242 = arith.constant 0 : index
    %309 = vector.load %arg13[%c0_241, %c0_242] : memref<1x96xf32, #tpu.memory_space<vmem>>, vector<1x96xf32>
    %310 = vector.broadcast %309 : vector<1x96xf32> to vector<2x96xf32>
    %311 = arith.addf %308, %310 : vector<2x96xf32>
    %312 = vector.extract_strided_slice %306 {offsets = [0, 0], sizes = [2, 32], strides = [1, 1]} : vector<2x96xf32> to vector<2x32xf32>
    %313 = vector.extract_strided_slice %311 {offsets = [0, 0], sizes = [2, 32], strides = [1, 1]} : vector<2x96xf32> to vector<2x32xf32>
    %314 = arith.addf %312, %313 : vector<2x32xf32>
    %315 = arith.negf %314 : vector<2x32xf32>
    %316 = math.exp %315 : vector<2x32xf32>
    %cst_243 = arith.constant 1.000000e+00 : f32
    %317 = vector.broadcast %cst_243 : f32 to vector<2x32xf32>
    %318 = arith.addf %317, %316 : vector<2x32xf32>
    %319 = arith.divf %317, %318 : vector<2x32xf32>
    %320 = vector.extract_strided_slice %306 {offsets = [0, 32], sizes = [2, 32], strides = [1, 1]} : vector<2x96xf32> to vector<2x32xf32>
    %321 = vector.extract_strided_slice %311 {offsets = [0, 32], sizes = [2, 32], strides = [1, 1]} : vector<2x96xf32> to vector<2x32xf32>
    %322 = arith.addf %320, %321 : vector<2x32xf32>
    %323 = arith.negf %322 : vector<2x32xf32>
    %324 = math.exp %323 : vector<2x32xf32>
    %cst_244 = arith.constant 1.000000e+00 : f32
    %325 = vector.broadcast %cst_244 : f32 to vector<2x32xf32>
    %326 = arith.addf %325, %324 : vector<2x32xf32>
    %327 = arith.divf %325, %326 : vector<2x32xf32>
    %328 = vector.extract_strided_slice %306 {offsets = [0, 64], sizes = [2, 32], strides = [1, 1]} : vector<2x96xf32> to vector<2x32xf32>
    %329 = vector.extract_strided_slice %311 {offsets = [0, 64], sizes = [2, 32], strides = [1, 1]} : vector<2x96xf32> to vector<2x32xf32>
    %330 = arith.mulf %319, %329 : vector<2x32xf32>
    %331 = arith.addf %328, %330 : vector<2x32xf32>
    %332 = math.tanh %331 : vector<2x32xf32>
    %cst_245 = arith.constant 1.000000e+00 : f32
    %333 = vector.broadcast %cst_245 : f32 to vector<2x32xf32>
    %334 = arith.subf %333, %327 : vector<2x32xf32>
    %335 = arith.mulf %334, %332 : vector<2x32xf32>
    %336 = arith.mulf %327, %298 : vector<2x32xf32>
    %337 = arith.addf %335, %336 : vector<2x32xf32>
    %c6_246 = arith.constant 6 : index
    %c0_247 = arith.constant 0 : index
    %338 = vector.load %arg19[%c6_246, %c0_247] : memref<16x32xf32, #tpu.memory_space<vmem>>, vector<2x32xf32>
    tpu.vector_store %arg19[%c6_246, %c0_247], %337 {strides = array<i32>} : memref<16x32xf32, #tpu.memory_space<vmem>>, vector<2x32xf32>,
    %c3_248 = arith.constant 3 : index
    %c0_249 = arith.constant 0 : index
    %c0_250 = arith.constant 0 : index
    %339 = vector.load %arg0[%c3_248, %c0_249, %c0_250] : memref<8x2x16xf32, #tpu.memory_space<vmem>>, vector<1x2x16xf32>
    %340 = vector.shape_cast %339 : vector<1x2x16xf32> to vector<2x16xf32>
    %c0_251 = arith.constant 0 : index
    %c0_252 = arith.constant 0 : index
    %341 = vector.load %arg10[%c0_251, %c0_252] : memref<16x96xf32, #tpu.memory_space<vmem>>, vector<16x96xf32>
    %cst_253 = arith.constant dense<0.000000e+00> : vector<2x96xf32>
    %342 = tpu.matmul %340, %341, %cst_253 {dimension_numbers = #tpu.dot_dimension_numbers<[1], [0], [0], [1], [0, 0, 1, 1], [], []>} : vector<2x16xf32>, vector<16x96xf32>, vector<2x96xf32> -> vector<2x96xf32>
    %c0_254 = arith.constant 0 : index
    %c0_255 = arith.constant 0 : index
    %343 = vector.load %arg11[%c0_254, %c0_255] : memref<1x96xf32, #tpu.memory_space<vmem>>, vector<1x96xf32>
    %344 = vector.broadcast %343 : vector<1x96xf32> to vector<2x96xf32>
    %345 = arith.addf %342, %344 : vector<2x96xf32>
    %c0_256 = arith.constant 0 : index
    %c0_257 = arith.constant 0 : index
    %346 = vector.load %arg12[%c0_256, %c0_257] : memref<32x96xf32, #tpu.memory_space<vmem>>, vector<32x96xf32>
    %cst_258 = arith.constant dense<0.000000e+00> : vector<2x96xf32>
    %347 = tpu.matmul %337, %346, %cst_258 {dimension_numbers = #tpu.dot_dimension_numbers<[1], [0], [0], [1], [0, 0, 1, 1], [], []>} : vector<2x32xf32>, vector<32x96xf32>, vector<2x96xf32> -> vector<2x96xf32>
    %c0_259 = arith.constant 0 : index
    %c0_260 = arith.constant 0 : index
    %348 = vector.load %arg13[%c0_259, %c0_260] : memref<1x96xf32, #tpu.memory_space<vmem>>, vector<1x96xf32>
    %349 = vector.broadcast %348 : vector<1x96xf32> to vector<2x96xf32>
    %350 = arith.addf %347, %349 : vector<2x96xf32>
    %351 = vector.extract_strided_slice %345 {offsets = [0, 0], sizes = [2, 32], strides = [1, 1]} : vector<2x96xf32> to vector<2x32xf32>
    %352 = vector.extract_strided_slice %350 {offsets = [0, 0], sizes = [2, 32], strides = [1, 1]} : vector<2x96xf32> to vector<2x32xf32>
    %353 = arith.addf %351, %352 : vector<2x32xf32>
    %354 = arith.negf %353 : vector<2x32xf32>
    %355 = math.exp %354 : vector<2x32xf32>
    %cst_261 = arith.constant 1.000000e+00 : f32
    %356 = vector.broadcast %cst_261 : f32 to vector<2x32xf32>
    %357 = arith.addf %356, %355 : vector<2x32xf32>
    %358 = arith.divf %356, %357 : vector<2x32xf32>
    %359 = vector.extract_strided_slice %345 {offsets = [0, 32], sizes = [2, 32], strides = [1, 1]} : vector<2x96xf32> to vector<2x32xf32>
    %360 = vector.extract_strided_slice %350 {offsets = [0, 32], sizes = [2, 32], strides = [1, 1]} : vector<2x96xf32> to vector<2x32xf32>
    %361 = arith.addf %359, %360 : vector<2x32xf32>
    %362 = arith.negf %361 : vector<2x32xf32>
    %363 = math.exp %362 : vector<2x32xf32>
    %cst_262 = arith.constant 1.000000e+00 : f32
    %364 = vector.broadcast %cst_262 : f32 to vector<2x32xf32>
    %365 = arith.addf %364, %363 : vector<2x32xf32>
    %366 = arith.divf %364, %365 : vector<2x32xf32>
    %367 = vector.extract_strided_slice %345 {offsets = [0, 64], sizes = [2, 32], strides = [1, 1]} : vector<2x96xf32> to vector<2x32xf32>
    %368 = vector.extract_strided_slice %350 {offsets = [0, 64], sizes = [2, 32], strides = [1, 1]} : vector<2x96xf32> to vector<2x32xf32>
    %369 = arith.mulf %358, %368 : vector<2x32xf32>
    %370 = arith.addf %367, %369 : vector<2x32xf32>
    %371 = math.tanh %370 : vector<2x32xf32>
    %cst_263 = arith.constant 1.000000e+00 : f32
    %372 = vector.broadcast %cst_263 : f32 to vector<2x32xf32>
    %373 = arith.subf %372, %366 : vector<2x32xf32>
    %374 = arith.mulf %373, %371 : vector<2x32xf32>
    %375 = arith.mulf %366, %337 : vector<2x32xf32>
    %376 = arith.addf %374, %375 : vector<2x32xf32>
    %c8 = arith.constant 8 : index
    %c0_264 = arith.constant 0 : index
    %377 = vector.load %arg19[%c8, %c0_264] : memref<16x32xf32, #tpu.memory_space<vmem>>, vector<2x32xf32>
    tpu.vector_store %arg19[%c8, %c0_264], %376 {strides = array<i32>} : memref<16x32xf32, #tpu.memory_space<vmem>>, vector<2x32xf32>,
    %c4_265 = arith.constant 4 : index
    %c0_266 = arith.constant 0 : index
    %c0_267 = arith.constant 0 : index
    %378 = vector.load %arg0[%c4_265, %c0_266, %c0_267] : memref<8x2x16xf32, #tpu.memory_space<vmem>>, vector<1x2x16xf32>
    %379 = vector.shape_cast %378 : vector<1x2x16xf32> to vector<2x16xf32>
    %c0_268 = arith.constant 0 : index
    %c0_269 = arith.constant 0 : index
    %380 = vector.load %arg10[%c0_268, %c0_269] : memref<16x96xf32, #tpu.memory_space<vmem>>, vector<16x96xf32>
    %cst_270 = arith.constant dense<0.000000e+00> : vector<2x96xf32>
    %381 = tpu.matmul %379, %380, %cst_270 {dimension_numbers = #tpu.dot_dimension_numbers<[1], [0], [0], [1], [0, 0, 1, 1], [], []>} : vector<2x16xf32>, vector<16x96xf32>, vector<2x96xf32> -> vector<2x96xf32>
    %c0_271 = arith.constant 0 : index
    %c0_272 = arith.constant 0 : index
    %382 = vector.load %arg11[%c0_271, %c0_272] : memref<1x96xf32, #tpu.memory_space<vmem>>, vector<1x96xf32>
    %383 = vector.broadcast %382 : vector<1x96xf32> to vector<2x96xf32>
    %384 = arith.addf %381, %383 : vector<2x96xf32>
    %c0_273 = arith.constant 0 : index
    %c0_274 = arith.constant 0 : index
    %385 = vector.load %arg12[%c0_273, %c0_274] : memref<32x96xf32, #tpu.memory_space<vmem>>, vector<32x96xf32>
    %cst_275 = arith.constant dense<0.000000e+00> : vector<2x96xf32>
    %386 = tpu.matmul %376, %385, %cst_275 {dimension_numbers = #tpu.dot_dimension_numbers<[1], [0], [0], [1], [0, 0, 1, 1], [], []>} : vector<2x32xf32>, vector<32x96xf32>, vector<2x96xf32> -> vector<2x96xf32>
    %c0_276 = arith.constant 0 : index
    %c0_277 = arith.constant 0 : index
    %387 = vector.load %arg13[%c0_276, %c0_277] : memref<1x96xf32, #tpu.memory_space<vmem>>, vector<1x96xf32>
    %388 = vector.broadcast %387 : vector<1x96xf32> to vector<2x96xf32>
    %389 = arith.addf %386, %388 : vector<2x96xf32>
    %390 = vector.extract_strided_slice %384 {offsets = [0, 0], sizes = [2, 32], strides = [1, 1]} : vector<2x96xf32> to vector<2x32xf32>
    %391 = vector.extract_strided_slice %389 {offsets = [0, 0], sizes = [2, 32], strides = [1, 1]} : vector<2x96xf32> to vector<2x32xf32>
    %392 = arith.addf %390, %391 : vector<2x32xf32>
    %393 = arith.negf %392 : vector<2x32xf32>
    %394 = math.exp %393 : vector<2x32xf32>
    %cst_278 = arith.constant 1.000000e+00 : f32
    %395 = vector.broadcast %cst_278 : f32 to vector<2x32xf32>
    %396 = arith.addf %395, %394 : vector<2x32xf32>
    %397 = arith.divf %395, %396 : vector<2x32xf32>
    %398 = vector.extract_strided_slice %384 {offsets = [0, 32], sizes = [2, 32], strides = [1, 1]} : vector<2x96xf32> to vector<2x32xf32>
    %399 = vector.extract_strided_slice %389 {offsets = [0, 32], sizes = [2, 32], strides = [1, 1]} : vector<2x96xf32> to vector<2x32xf32>
    %400 = arith.addf %398, %399 : vector<2x32xf32>
    %401 = arith.negf %400 : vector<2x32xf32>
    %402 = math.exp %401 : vector<2x32xf32>
    %cst_279 = arith.constant 1.000000e+00 : f32
    %403 = vector.broadcast %cst_279 : f32 to vector<2x32xf32>
    %404 = arith.addf %403, %402 : vector<2x32xf32>
    %405 = arith.divf %403, %404 : vector<2x32xf32>
    %406 = vector.extract_strided_slice %384 {offsets = [0, 64], sizes = [2, 32], strides = [1, 1]} : vector<2x96xf32> to vector<2x32xf32>
    %407 = vector.extract_strided_slice %389 {offsets = [0, 64], sizes = [2, 32], strides = [1, 1]} : vector<2x96xf32> to vector<2x32xf32>
    %408 = arith.mulf %397, %407 : vector<2x32xf32>
    %409 = arith.addf %406, %408 : vector<2x32xf32>
    %410 = math.tanh %409 : vector<2x32xf32>
    %cst_280 = arith.constant 1.000000e+00 : f32
    %411 = vector.broadcast %cst_280 : f32 to vector<2x32xf32>
    %412 = arith.subf %411, %405 : vector<2x32xf32>
    %413 = arith.mulf %412, %410 : vector<2x32xf32>
    %414 = arith.mulf %405, %376 : vector<2x32xf32>
    %415 = arith.addf %413, %414 : vector<2x32xf32>
    %c10 = arith.constant 10 : index
    %c0_281 = arith.constant 0 : index
    %416 = vector.load %arg19[%c10, %c0_281] : memref<16x32xf32, #tpu.memory_space<vmem>>, vector<2x32xf32>
    tpu.vector_store %arg19[%c10, %c0_281], %415 {strides = array<i32>} : memref<16x32xf32, #tpu.memory_space<vmem>>, vector<2x32xf32>,
    %c5_282 = arith.constant 5 : index
    %c0_283 = arith.constant 0 : index
    %c0_284 = arith.constant 0 : index
    %417 = vector.load %arg0[%c5_282, %c0_283, %c0_284] : memref<8x2x16xf32, #tpu.memory_space<vmem>>, vector<1x2x16xf32>
    %418 = vector.shape_cast %417 : vector<1x2x16xf32> to vector<2x16xf32>
    %c0_285 = arith.constant 0 : index
    %c0_286 = arith.constant 0 : index
    %419 = vector.load %arg10[%c0_285, %c0_286] : memref<16x96xf32, #tpu.memory_space<vmem>>, vector<16x96xf32>
    %cst_287 = arith.constant dense<0.000000e+00> : vector<2x96xf32>
    %420 = tpu.matmul %418, %419, %cst_287 {dimension_numbers = #tpu.dot_dimension_numbers<[1], [0], [0], [1], [0, 0, 1, 1], [], []>} : vector<2x16xf32>, vector<16x96xf32>, vector<2x96xf32> -> vector<2x96xf32>
    %c0_288 = arith.constant 0 : index
    %c0_289 = arith.constant 0 : index
    %421 = vector.load %arg11[%c0_288, %c0_289] : memref<1x96xf32, #tpu.memory_space<vmem>>, vector<1x96xf32>
    %422 = vector.broadcast %421 : vector<1x96xf32> to vector<2x96xf32>
    %423 = arith.addf %420, %422 : vector<2x96xf32>
    %c0_290 = arith.constant 0 : index
    %c0_291 = arith.constant 0 : index
    %424 = vector.load %arg12[%c0_290, %c0_291] : memref<32x96xf32, #tpu.memory_space<vmem>>, vector<32x96xf32>
    %cst_292 = arith.constant dense<0.000000e+00> : vector<2x96xf32>
    %425 = tpu.matmul %415, %424, %cst_292 {dimension_numbers = #tpu.dot_dimension_numbers<[1], [0], [0], [1], [0, 0, 1, 1], [], []>} : vector<2x32xf32>, vector<32x96xf32>, vector<2x96xf32> -> vector<2x96xf32>
    %c0_293 = arith.constant 0 : index
    %c0_294 = arith.constant 0 : index
    %426 = vector.load %arg13[%c0_293, %c0_294] : memref<1x96xf32, #tpu.memory_space<vmem>>, vector<1x96xf32>
    %427 = vector.broadcast %426 : vector<1x96xf32> to vector<2x96xf32>
    %428 = arith.addf %425, %427 : vector<2x96xf32>
    %429 = vector.extract_strided_slice %423 {offsets = [0, 0], sizes = [2, 32], strides = [1, 1]} : vector<2x96xf32> to vector<2x32xf32>
    %430 = vector.extract_strided_slice %428 {offsets = [0, 0], sizes = [2, 32], strides = [1, 1]} : vector<2x96xf32> to vector<2x32xf32>
    %431 = arith.addf %429, %430 : vector<2x32xf32>
    %432 = arith.negf %431 : vector<2x32xf32>
    %433 = math.exp %432 : vector<2x32xf32>
    %cst_295 = arith.constant 1.000000e+00 : f32
    %434 = vector.broadcast %cst_295 : f32 to vector<2x32xf32>
    %435 = arith.addf %434, %433 : vector<2x32xf32>
    %436 = arith.divf %434, %435 : vector<2x32xf32>
    %437 = vector.extract_strided_slice %423 {offsets = [0, 32], sizes = [2, 32], strides = [1, 1]} : vector<2x96xf32> to vector<2x32xf32>
    %438 = vector.extract_strided_slice %428 {offsets = [0, 32], sizes = [2, 32], strides = [1, 1]} : vector<2x96xf32> to vector<2x32xf32>
    %439 = arith.addf %437, %438 : vector<2x32xf32>
    %440 = arith.negf %439 : vector<2x32xf32>
    %441 = math.exp %440 : vector<2x32xf32>
    %cst_296 = arith.constant 1.000000e+00 : f32
    %442 = vector.broadcast %cst_296 : f32 to vector<2x32xf32>
    %443 = arith.addf %442, %441 : vector<2x32xf32>
    %444 = arith.divf %442, %443 : vector<2x32xf32>
    %445 = vector.extract_strided_slice %423 {offsets = [0, 64], sizes = [2, 32], strides = [1, 1]} : vector<2x96xf32> to vector<2x32xf32>
    %446 = vector.extract_strided_slice %428 {offsets = [0, 64], sizes = [2, 32], strides = [1, 1]} : vector<2x96xf32> to vector<2x32xf32>
    %447 = arith.mulf %436, %446 : vector<2x32xf32>
    %448 = arith.addf %445, %447 : vector<2x32xf32>
    %449 = math.tanh %448 : vector<2x32xf32>
    %cst_297 = arith.constant 1.000000e+00 : f32
    %450 = vector.broadcast %cst_297 : f32 to vector<2x32xf32>
    %451 = arith.subf %450, %444 : vector<2x32xf32>
    %452 = arith.mulf %451, %449 : vector<2x32xf32>
    %453 = arith.mulf %444, %415 : vector<2x32xf32>
    %454 = arith.addf %452, %453 : vector<2x32xf32>
    %c12 = arith.constant 12 : index
    %c0_298 = arith.constant 0 : index
    %455 = vector.load %arg19[%c12, %c0_298] : memref<16x32xf32, #tpu.memory_space<vmem>>, vector<2x32xf32>
    tpu.vector_store %arg19[%c12, %c0_298], %454 {strides = array<i32>} : memref<16x32xf32, #tpu.memory_space<vmem>>, vector<2x32xf32>,
    %c6_299 = arith.constant 6 : index
    %c0_300 = arith.constant 0 : index
    %c0_301 = arith.constant 0 : index
    %456 = vector.load %arg0[%c6_299, %c0_300, %c0_301] : memref<8x2x16xf32, #tpu.memory_space<vmem>>, vector<1x2x16xf32>
    %457 = vector.shape_cast %456 : vector<1x2x16xf32> to vector<2x16xf32>
    %c0_302 = arith.constant 0 : index
    %c0_303 = arith.constant 0 : index
    %458 = vector.load %arg10[%c0_302, %c0_303] : memref<16x96xf32, #tpu.memory_space<vmem>>, vector<16x96xf32>
    %cst_304 = arith.constant dense<0.000000e+00> : vector<2x96xf32>
    %459 = tpu.matmul %457, %458, %cst_304 {dimension_numbers = #tpu.dot_dimension_numbers<[1], [0], [0], [1], [0, 0, 1, 1], [], []>} : vector<2x16xf32>, vector<16x96xf32>, vector<2x96xf32> -> vector<2x96xf32>
    %c0_305 = arith.constant 0 : index
    %c0_306 = arith.constant 0 : index
    %460 = vector.load %arg11[%c0_305, %c0_306] : memref<1x96xf32, #tpu.memory_space<vmem>>, vector<1x96xf32>
    %461 = vector.broadcast %460 : vector<1x96xf32> to vector<2x96xf32>
    %462 = arith.addf %459, %461 : vector<2x96xf32>
    %c0_307 = arith.constant 0 : index
    %c0_308 = arith.constant 0 : index
    %463 = vector.load %arg12[%c0_307, %c0_308] : memref<32x96xf32, #tpu.memory_space<vmem>>, vector<32x96xf32>
    %cst_309 = arith.constant dense<0.000000e+00> : vector<2x96xf32>
    %464 = tpu.matmul %454, %463, %cst_309 {dimension_numbers = #tpu.dot_dimension_numbers<[1], [0], [0], [1], [0, 0, 1, 1], [], []>} : vector<2x32xf32>, vector<32x96xf32>, vector<2x96xf32> -> vector<2x96xf32>
    %c0_310 = arith.constant 0 : index
    %c0_311 = arith.constant 0 : index
    %465 = vector.load %arg13[%c0_310, %c0_311] : memref<1x96xf32, #tpu.memory_space<vmem>>, vector<1x96xf32>
    %466 = vector.broadcast %465 : vector<1x96xf32> to vector<2x96xf32>
    %467 = arith.addf %464, %466 : vector<2x96xf32>
    %468 = vector.extract_strided_slice %462 {offsets = [0, 0], sizes = [2, 32], strides = [1, 1]} : vector<2x96xf32> to vector<2x32xf32>
    %469 = vector.extract_strided_slice %467 {offsets = [0, 0], sizes = [2, 32], strides = [1, 1]} : vector<2x96xf32> to vector<2x32xf32>
    %470 = arith.addf %468, %469 : vector<2x32xf32>
    %471 = arith.negf %470 : vector<2x32xf32>
    %472 = math.exp %471 : vector<2x32xf32>
    %cst_312 = arith.constant 1.000000e+00 : f32
    %473 = vector.broadcast %cst_312 : f32 to vector<2x32xf32>
    %474 = arith.addf %473, %472 : vector<2x32xf32>
    %475 = arith.divf %473, %474 : vector<2x32xf32>
    %476 = vector.extract_strided_slice %462 {offsets = [0, 32], sizes = [2, 32], strides = [1, 1]} : vector<2x96xf32> to vector<2x32xf32>
    %477 = vector.extract_strided_slice %467 {offsets = [0, 32], sizes = [2, 32], strides = [1, 1]} : vector<2x96xf32> to vector<2x32xf32>
    %478 = arith.addf %476, %477 : vector<2x32xf32>
    %479 = arith.negf %478 : vector<2x32xf32>
    %480 = math.exp %479 : vector<2x32xf32>
    %cst_313 = arith.constant 1.000000e+00 : f32
    %481 = vector.broadcast %cst_313 : f32 to vector<2x32xf32>
    %482 = arith.addf %481, %480 : vector<2x32xf32>
    %483 = arith.divf %481, %482 : vector<2x32xf32>
    %484 = vector.extract_strided_slice %462 {offsets = [0, 64], sizes = [2, 32], strides = [1, 1]} : vector<2x96xf32> to vector<2x32xf32>
    %485 = vector.extract_strided_slice %467 {offsets = [0, 64], sizes = [2, 32], strides = [1, 1]} : vector<2x96xf32> to vector<2x32xf32>
    %486 = arith.mulf %475, %485 : vector<2x32xf32>
    %487 = arith.addf %484, %486 : vector<2x32xf32>
    %488 = math.tanh %487 : vector<2x32xf32>
    %cst_314 = arith.constant 1.000000e+00 : f32
    %489 = vector.broadcast %cst_314 : f32 to vector<2x32xf32>
    %490 = arith.subf %489, %483 : vector<2x32xf32>
    %491 = arith.mulf %490, %488 : vector<2x32xf32>
    %492 = arith.mulf %483, %454 : vector<2x32xf32>
    %493 = arith.addf %491, %492 : vector<2x32xf32>
    %c14 = arith.constant 14 : index
    %c0_315 = arith.constant 0 : index
    %494 = vector.load %arg19[%c14, %c0_315] : memref<16x32xf32, #tpu.memory_space<vmem>>, vector<2x32xf32>
    tpu.vector_store %arg19[%c14, %c0_315], %493 {strides = array<i32>} : memref<16x32xf32, #tpu.memory_space<vmem>>, vector<2x32xf32>,
    %c0_316 = arith.constant 0 : index
    %c0_317 = arith.constant 0 : index
    %495 = vector.load %arg19[%c0_316, %c0_317] : memref<16x32xf32, #tpu.memory_space<vmem>>, vector<16x32xf32>
    %c0_318 = arith.constant 0 : index
    %c0_319 = arith.constant 0 : index
    %496 = vector.load %arg14[%c0_318, %c0_319] : memref<32x16xf32, #tpu.memory_space<vmem>>, vector<32x16xf32>
    %cst_320 = arith.constant dense<0.000000e+00> : vector<16x16xf32>
    %497 = tpu.matmul %495, %496, %cst_320 {dimension_numbers = #tpu.dot_dimension_numbers<[1], [0], [0], [1], [0, 0, 1, 1], [], []>} : vector<16x32xf32>, vector<32x16xf32>, vector<16x16xf32> -> vector<16x16xf32>
    %c0_321 = arith.constant 0 : index
    %c0_322 = arith.constant 0 : index
    %498 = vector.load %arg15[%c0_321, %c0_322] : memref<1x16xf32, #tpu.memory_space<vmem>>, vector<1x16xf32>
    %499 = vector.broadcast %498 : vector<1x16xf32> to vector<16x16xf32>
    %500 = arith.addf %497, %499 : vector<16x16xf32>
    %c0_323 = arith.constant 0 : index
    %c0_324 = arith.constant 0 : index
    %501 = vector.load %arg16[%c0_323, %c0_324] : memref<16x16xf32, #tpu.memory_space<vmem>>, vector<16x16xf32>
    tpu.vector_store %arg16[%c0_323, %c0_324], %500 {strides = array<i32>} : memref<16x16xf32, #tpu.memory_space<vmem>>, vector<16x16xf32>,
    return
  }
}

</mosaic_0001>

<bundles_post_ra>
// kernel: molecule_vae_forward.1
= control target key start
LH: loop header
LB: loop body
LE: loop exit
PB: predicated region body
PF: predicated region fallthrough
CT: control target
= control target key end

     0   :  { %s3467_s0 = inlined_call_operand.vmem [shape: f32[8,2,16], index: 0, kind: input, shape index: {}]   ;;  %s3468_s1 = inlined_call_operand.vmem [shape: f32[3,16,8], index: 1, kind: input, shape index: {}]   ;;  %s3469_s2 = inlined_call_operand.vmem [shape: f32[1,8], index: 2, kind: input, shape index: {}]   ;;  %s3470_s3 = inlined_call_operand.vmem [shape: f32[6,8,435], index: 3, kind: input, shape index: {}]   ;;  %s3471_s4 = inlined_call_operand.vmem [shape: f32[1,435], index: 4, kind: input, shape index: {}]   ;;  %s3472_s5 = inlined_call_operand.vmem [shape: f32[435,32], index: 5, kind: input, shape index: {}]   ;;  %s3473_s6 = inlined_call_operand.vmem [shape: f32[1,32], index: 6, kind: input, shape index: {}]   ;;  %s3474_s7 = inlined_call_operand.vmem [shape: f32[435,32], index: 7, kind: input, shape index: {}]   ;;  %s3475_s8 = inlined_call_operand.vmem [shape: f32[1,32], index: 8, kind: input, shape index: {}]   ;;  %s3476_s9 = inlined_call_operand.vmem [shape: f32[2,32], index: 9, kind: input, shape index: {}]   ;;  %s3477_s10 = inlined_call_operand.vmem [shape: f32[16,96], index: 10, kind: input, shape index: {}]   ;;  %s3478_s11 = inlined_call_operand.vmem [shape: f32[1,96], index: 11, kind: input, shape index: {}]   ;;  %s3479_s12 = inlined_call_operand.vmem [shape: f32[32,96], index: 12, kind: input, shape index: {}]   ;;  %s3480_s13 = inlined_call_operand.vmem [shape: f32[1,96], index: 13, kind: input, shape index: {}]   ;;  %s3481_s14 = inlined_call_operand.vmem [shape: f32[32,16], index: 14, kind: input, shape index: {}]   ;;  %s3482_s15 = inlined_call_operand.vmem [shape: f32[1,16], index: 15, kind: input, shape index: {}]   ;;  %s3483_s16 = inlined_call_operand.vmem [shape: f32[16,16], index: 16, kind: output, shape index: {0}]   ;;  %s3484_s17 = inlined_call_operand.hbm [shape: f32[2,32], index: 17, kind: output, shape index: {1}]   ;;  %s3485_s18 = inlined_call_operand.hbm [shape: f32[2,32], index: 18, kind: output, shape index: {2}]  }
   0x1   :  { %3488 = sst [smem:[#allocation9_spill]] %s3467_s0 }
   0x2   :  { %3489 = sst [smem:[#allocation10_spill]] %s3468_s1 }
   0x3   :  { %3490 = sst [smem:[#allocation11_spill]] %s3469_s2 }
   0x4   :  { %24 = vsyncpa [#allocation4], 0  ;;  %s3491_s29 = sld [smem:[#allocation10_spill]]  ;;  %vm63_vm0 = vcmask 130048  }
   0x5   :  { %s3492_s20 = sld [smem:[#allocation9_spill]] }
   0xa   :  { %v2615_v0 = vld [vmem:[%s3491_s29 + $0x18] sm:$0xff]  ;;  %v2620_v1 = vld [vmem:[%s3491_s29 + $0x10] sm:$0xff]  ;;  %v2629_v3 = vld [vmem:[%s3491_s29 + $0x8] sm:$0xff] }
   0xb   :  { %113 = vmatpush.msra.mxu2 %v2615_v0  ;;  %v2275_v2 = vld [vmem:[%s3492_s20 + $0x2] sm:$0x3]  ;;  %v2639_v5 = vld [vmem:[%s3491_s29 + $0x28] sm:$0xff]  ;;  %81 = vmatpush.msra.mxu0 %v2629_v3  ;;  %v60_v6 = vld [vmem:[%s3492_s20] sm:$0x3] }
   0xc   :  { %v2634_v4 = vld [vmem:[%s3491_s29] sm:$0xff] }
   0xd   :  { %v2648_v7 = vld [vmem:[%s3491_s29 + $0x20] sm:$0xff]  ;;  %114 = vmatpush.msra.mxu2 %v2620_v1  ;;  %82 = vmatpush.msra.mxu0 %v2634_v4 }
   0xe   :  { %2278 = vmatmul.msk.f32.vlgmr.msra.gmra.mxu2 %vm63_vm0, %v2275_v2  ;;  %2274 = vmatmul.msk.f32.vlgmr.msra.gmra.mxu0 %vm63_vm0, %v60_v6  ;;  %v2660_v8 = vld [vmem:[%s3492_s20 + $0x4] sm:$0x3] }
   0xf   :  { %142 = vmatpush.msrb.mxu2 %v2639_v5 }
  0x11   :  { %143 = vmatpush.msrb.mxu2 %v2648_v7 }
  0x13   :  { %265 = vmatpush.msra.mxu2 %v2629_v3 }
  0x14   :  { %25 = vsyncpa [#allocation6], 0  ;;  %v150_v9 = vld [vmem:[%s3470_s3] sm:$0xff]  ;;  %v152_v10 = vld [vmem:[%s3470_s3 + $0x10] sm:$0xff]  ;;  %s3493_s28 = sld [smem:[#allocation11_spill]]  ;;  %vm154_vm1 = vcmask 64512  }
  0x15   :  { %266 = vmatpush.msra.mxu2 %v2634_v4  ;;  %v153_v11 = vld [vmem:[%s3470_s3 + $0x18] sm:$0xff]  ;;  %173 = vmatpush.msra.mxu3 %v150_v9  ;;  %v151_v12 = vld [vmem:[%s3470_s3 + $0x8] sm:$0xff]  ;;  %v2694_v21 = vld [vmem:[%s3492_s20 + $0x6] sm:$0x3]  ;;  %vm1123_vm2 = vcmask 1042432   ;;  %vm1119_vm3 = vcmask 416768  }
  0x16   :  { %2282 = vmatmul.msk.f32.vlgmr.msrb.gmra.mxu2 %vm63_vm0, %v2660_v8  ;;  %213 = vmatpush.msrb.mxu0 %v152_v10  ;;  %v2292_v22 = vld [vmem:[%s3470_s3 + $0x28] sm:$0xff]  ;;  %v2293_v23 = vld [vmem:[%s3470_s3 + $0x30] sm:$0xff]  ;;  %v2291_v24 = vld [vmem:[%s3470_s3 + $0x20] sm:$0xff]  ;;  %vm1352_vm5 = vcmask 254976   ;;  %vm1397_vm6 = vcmask 261120   ;;  %s2514_s0 = smov 32  }
  0x17   :  { %233 = vmatpush.msra.mxu1 %v153_v11  ;;  %193 = vmatpush.msrb.mxu3 %v151_v12  ;;  %v2294_v25 = vld [vmem:[%s3470_s3 + $0x38] sm:$0xff]  ;;  %v2727_v36 = vld [vmem:[%s3492_s20 + $0x8] sm:$0x3]  ;;  %v2305_v37 = vld [vmem:[%s3470_s3 + $0x50] sm:$0xff]  ;;  %s2247_s25 = sshll.u32 %s3484_s17, 4  ;;  %s2516_s26 = smov [#allocation5]   ;;  %s2248_s25 = int_to_ptr.hbm [resolvable:$true] %s2247_s25 }
  0x18   :  { %312 = vmatpush.msra.mxu0 %v2639_v5  ;;  %363 = vmatpush.msrb.mxu2 %v2292_v22  ;;  %v2303_v38 = vld [vmem:[%s3470_s3 + $0x40] sm:$0xff]  ;;  %v2304_v39 = vld [vmem:[%s3470_s3 + $0x48] sm:$0xff]  ;;  %v2306_v40 = vld [vmem:[%s3470_s3 + $0x58] sm:$0xff] }
  0x19   :  { %343 = vmatpush.msrb.mxu1 %v2291_v24  ;;  %v2758_v42 = vld [vmem:[%s3471_s4] sm:$0xf]  ;;  %v2771_v62 = vld [vmem:[%s3492_s20 + $0xa] sm:$0x3]  ;;  %v2317_v6 = vld [vmem:[%s3470_s3 + $0x70] sm:$0xff] }
  0x1a   :  { %313 = vmatpush.msra.mxu0 %v2648_v7  ;;  %v2683_v13 = vld [vmem:[%s3493_s28] ss:$0 sm:$0xff]  ;;  %v239_v43 = vperm.slane %v2758_v42, 0  ;;  %v240_v46 = vperm.slane %v2758_v42, 1  ;;  %v241_v48 = vperm.slane %v2758_v42, 2 }
  0x1b   :  { %v2315_v63 = vld [vmem:[%s3470_s3 + $0x60] sm:$0xff]  ;;  %v2325_v24 = vld [vmem:[%s3492_s20 + $0xc] sm:$0x3] }
  0x1e   :  { %2287 = vmatmul.msk.f32.vlgmr.msra.gmra.mxu2 %vm63_vm0, %v2275_v2  ;;  %v2316_v2 = vld [vmem:[%s3470_s3 + $0x68] sm:$0xff] }
  0x1f   :  { %447 = vmatpush.msra.mxu2 %v2615_v0 }
  0x21   :  { %448 = vmatpush.msra.mxu2 %v2620_v1 }
  0x8b   :  { %v84_v14 = vpop.f32.mrf.mxu0 }
  0x8c   :  { %v90_v16 = vadd.f32 %v2683_v13, %v84_v14 }
  0x91   :  { %v116_v15 = vpop.f32.mrf.mxu2 }
  0x92   :  { %v119_v17 = vadd.f32 %v116_v15, %v90_v16 }
  0x99   :  { %v145_v18 = vpop.f32.mrf.mxu2 }
  0x9a   :  { %v148_v19 = vadd.f32 %v145_v18, %v119_v17 }
  0x9c   :  { %v149_v20 = vmax.f32 %v148_v19, 0.0 }
  0x9e   :  { %2283 = vmatmul.msk.f32.vlgmr.msra.gmra.mxu3 %vm154_vm1, %v149_v20  ;;  %2285 = vmatmul.msk.f32.vlgmr.msrb.gmra.mxu0 %vm154_vm1, %v149_v20 }
  0x9f   :  { %2286 = vmatmul.msk.f32.vlgmr.msra.gmra.mxu1 %vm154_vm1, %v149_v20  ;;  %286 = vmatpush.msra.mxu3 %v2615_v0 }
  0xa0   :  { %403 = vmatpush.msrb.mxu0 %v2294_v25  ;;  %426 = vmatpush.msra.mxu1 %v2629_v3  ;;  %v2327_v25 = vld [vmem:[%s3470_s3 + $0x80] sm:$0xff] }
  0xa1   :  { %287 = vmatpush.msra.mxu3 %v2620_v1  ;;  %v268_v29 = vpop.f32.mrf.mxu2 }
  0xa2   :  { %427 = vmatpush.msra.mxu1 %v2634_v4  ;;  %v271_v30 = vadd.f32 %v2683_v13, %v268_v29 }
  0xa6   :  { %2284 = vmatmul.msk.f32.vlgmr.msrb.gmra.mxu3 %vm154_vm1, %v149_v20  ;;  %2290 = vmatmul.msk.f32.vlgmr.msra.gmra.mxu0 %vm63_vm0, %v2694_v21 }
  0xa7   :  { %383 = vmatpush.msrb.mxu3 %v2293_v23  ;;  %504 = vmatpush.msra.mxu0 %v2303_v38  ;;  %v2340_v38 = vld [vmem:[%s3470_s3 + $0xa8] sm:$0xff] }
  0xae   :  { %2288 = vmatmul.msk.f32.vlgmr.msra.gmra.mxu3 %vm63_vm0, %v2660_v8 }
  0xaf   :  { %473 = vmatpush.msra.mxu3 %v2639_v5 }
  0xb1   :  { %474 = vmatpush.msra.mxu3 %v2648_v7 }
 0x11b   :  { %v215_v27 = vpop.f32.mrf.mxu0 }
 0x11c   :  { %v2753_v41 = vpop.f32.mrf.mxu1  ;;  %v249_v50 = vadd.f32 %v241_v48, %v215_v27  ;;  %v2329_v27 = vld [vmem:[%s3470_s3 + $0x90] sm:$0xff] }
 0x11d   :  { %v1090_v48 = vld [vmem:[%s3472_s5 + $0xf0] sm:$0xff] }
 0x121   :  { %v175_v26 = vpop.f32.mrf.mxu3 }
 0x122   :  { %v247_v44 = vadd.f32 %v239_v43, %v175_v26  ;;  %v2328_v26 = vld [vmem:[%s3470_s3 + $0x88] sm:$0xff]  ;;  %v2342_v43 = vld [vmem:[%s3470_s3 + $0xb8] sm:$0xff] }
 0x123   :  { %v315_v32 = vpop.f32.mrf.mxu0 }
 0x129   :  { %v195_v28 = vpop.f32.mrf.mxu3 }
 0x12a   :  { %v248_v49 = vadd.f32 %v240_v46, %v195_v28  ;;  %v2330_v28 = vld [vmem:[%s3470_s3 + $0x98] sm:$0xff] }
 0x12b   :  { %v1091_v46 = vld [vmem:[%s3472_s5 + $0xf8] sm:$0xff] }
 0x131   :  { %v289_v31 = vpop.f32.mrf.mxu3 }
 0x132   :  { %v292_v33 = vadd.f32 %v289_v31, %v271_v30 }
 0x134   :  { %v318_v34 = vadd.f32 %v315_v32, %v292_v33 }
 0x136   :  { %v319_v35 = vmax.f32 %v318_v34, 0.0 }
 0x138   :  { %2295 = vmatmul.msk.f32.vlgmr.msrb.gmra.mxu1 %vm154_vm1, %v319_v35  ;;  %2296 = vmatmul.msk.f32.vlgmr.msrb.gmra.mxu2 %vm154_vm1, %v319_v35 }
 0x139   :  { %2297 = vmatmul.msk.f32.vlgmr.msrb.gmra.mxu3 %vm154_vm1, %v319_v35  ;;  %2298 = vmatmul.msk.f32.vlgmr.msrb.gmra.mxu0 %vm154_vm1, %v319_v35 }
 0x13a   :  { %544 = vmatpush.msrb.mxu2 %v2305_v37  ;;  %587 = vmatpush.msrb.mxu0 %v2629_v3 }
 0x13b   :  { %524 = vmatpush.msrb.mxu1 %v2304_v39  ;;  %564 = vmatpush.msrb.mxu3 %v2306_v40  ;;  %v2341_v39 = vld [vmem:[%s3470_s3 + $0xb0] sm:$0xff]  ;;  %v2339_v40 = vld [vmem:[%s3470_s3 + $0xa0] sm:$0xff] }
 0x13c   :  { %588 = vmatpush.msrb.mxu0 %v2634_v4 }
 0x140   :  { %2300 = vmatmul.msk.f32.vlgmr.msra.gmra.mxu2 %vm63_vm0, %v2694_v21  ;;  %2299 = vmatmul.msk.f32.vlgmr.msra.gmra.mxu1 %vm63_vm0, %v2660_v8  ;;  %v2318_v8 = vld [vmem:[%s3470_s3 + $0x78] sm:$0xff] }
 0x141   :  { %2302 = vmatmul.msk.f32.vlgmr.msra.gmra.mxu3 %vm63_vm0, %v2727_v36  ;;  %634 = vmatpush.msra.mxu2 %v2639_v5 }
 0x142   :  { %608 = vmatpush.msra.mxu1 %v2615_v0  ;;  %665 = vmatpush.msra.mxu3 %v2315_v63 }
 0x143   :  { %635 = vmatpush.msra.mxu2 %v2648_v7 }
 0x144   :  { %609 = vmatpush.msra.mxu1 %v2620_v1 }
 0x1b5   :  { %v345_v45 = vpop.f32.mrf.mxu1 }
 0x1b6   :  { %v408_v47 = vadd.f32 %v345_v45, %v247_v44  ;;  %v2797_v9 = vpop.f32.mrf.mxu0  ;;  %v1075_v44 = vld [vmem:[%s3472_s5 + $0x78] sm:$0xff]  ;;  %v1074_v45 = vld [vmem:[%s3472_s5 + $0x70] sm:$0xff] }
 0x1bb   :  { %v365_v51 = vpop.f32.mrf.mxu2 }
 0x1bc   :  { %v409_v52 = vadd.f32 %v365_v51, %v248_v49  ;;  %v385_v53 = vpop.f32.mrf.mxu3  ;;  %v1089_v49 = vld [vmem:[%s3472_s5 + $0xe8] sm:$0xff]  ;;  %v1088_v51 = vld [vmem:[%s3472_s5 + $0xe0] sm:$0xff] }
 0x1bd   :  { %v410_v54 = vadd.f32 %v385_v53, %v249_v50  ;;  %v429_v55 = vpop.f32.mrf.mxu1  ;;  %v1072_v50 = vld [vmem:[%s3472_s5 + $0x60] sm:$0xff] }
 0x1be   :  { %v432_v56 = vadd.f32 %v2683_v13, %v429_v55  ;;  %v1113_v55 = vld [vmem:[%s3472_s5 + $0x1a8] sm:$0xff] }
 0x1c3   :  { %v450_v57 = vpop.f32.mrf.mxu2 }
 0x1c4   :  { %v453_v58 = vadd.f32 %v450_v57, %v432_v56  ;;  %v476_v59 = vpop.f32.mrf.mxu3  ;;  %v1087_v56 = vld [vmem:[%s3472_s5 + $0xd8] sm:$0xff]  ;;  %v1112_v57 = vld [vmem:[%s3472_s5 + $0x1a0] sm:$0xff] }
 0x1c6   :  { %v479_v60 = vadd.f32 %v476_v59, %v453_v58  ;;  %v1070_v58 = vld [vmem:[%s3472_s5 + $0x50] sm:$0xff]  ;;  %v1107_v59 = vld [vmem:[%s3472_s5 + $0x178] sm:$0xff] }
 0x1c8   :  { %v480_v61 = vmax.f32 %v479_v60, 0.0 }
 0x1ca   :  { %2307 = vmatmul.msk.f32.vlgmr.msra.gmra.mxu0 %vm154_vm1, %v480_v61  ;;  %2308 = vmatmul.msk.f32.vlgmr.msrb.gmra.mxu1 %vm154_vm1, %v480_v61 }
 0x1cb   :  { %2309 = vmatmul.msk.f32.vlgmr.msrb.gmra.mxu2 %vm154_vm1, %v480_v61  ;;  %2310 = vmatmul.msk.f32.vlgmr.msrb.gmra.mxu3 %vm154_vm1, %v480_v61  ;;  %v1086_v61 = vld [vmem:[%s3472_s5 + $0xd0] sm:$0xff] }
 0x1cc   :  { %748 = vmatpush.msrb.mxu3 %v2629_v3  ;;  %685 = vmatpush.msra.mxu0 %v2316_v2  ;;  %v1069_v2 = vld [vmem:[%s3472_s5 + $0x48] sm:$0xff] }
 0x1cd   :  { %705 = vmatpush.msrb.mxu1 %v2317_v6  ;;  %725 = vmatpush.msrb.mxu2 %v2318_v8  ;;  %v1106_v6 = vld [vmem:[%s3472_s5 + $0x170] sm:$0xff]  ;;  %v1085_v8 = vld [vmem:[%s3472_s5 + $0xc8] sm:$0xff] }
 0x1ce   :  { %749 = vmatpush.msrb.mxu3 %v2634_v4 }
 0x1d2   :  { %2311 = vmatmul.msk.f32.vlgmr.msrb.gmra.mxu0 %vm63_vm0, %v2694_v21  ;;  %2312 = vmatmul.msk.f32.vlgmr.msra.gmra.mxu1 %vm63_vm0, %v2727_v36 }
 0x1d3   :  { %2314 = vmatmul.msk.f32.vlgmr.msra.gmra.mxu2 %vm63_vm0, %v2771_v62  ;;  %769 = vmatpush.msrb.mxu0 %v2615_v0 }
 0x1d4   :  { %795 = vmatpush.msra.mxu1 %v2639_v5  ;;  %826 = vmatpush.msra.mxu2 %v2327_v25  ;;  %v1066_v25 = vld [vmem:[%s3472_s5 + $0x30] sm:$0xff] }
 0x1d5   :  { %770 = vmatpush.msrb.mxu0 %v2620_v1 }
 0x1d6   :  { %796 = vmatpush.msra.mxu1 %v2648_v7 }
 0x247   :  { %v506_v10 = vpop.f32.mrf.mxu0  ;;  %v526_v11 = vpop.f32.mrf.mxu1 }
 0x248   :  { %v569_v12 = vadd.f32 %v506_v10, %v408_v47  ;;  %v570_v14 = vadd.f32 %v526_v11, %v409_v52  ;;  %v1073_v47 = vld [vmem:[%s3472_s5 + $0x68] sm:$0xff]  ;;  %v1114_v52 = vld [vmem:[%s3472_s5 + $0x1b0] sm:$0x7] }
 0x249   :  { %v1110_v10 = vld [vmem:[%s3472_s5 + $0x190] sm:$0xff]  ;;  %v1105_v11 = vld [vmem:[%s3472_s5 + $0x168] sm:$0xff] }
 0x24e   :  { %v546_v15 = vpop.f32.mrf.mxu2 }
 0x24f   :  { %v571_v16 = vadd.f32 %v546_v15, %v410_v54  ;;  %v590_v17 = vpop.f32.mrf.mxu0  ;;  %v611_v19 = vpop.f32.mrf.mxu1  ;;  %v1071_v54 = vld [vmem:[%s3472_s5 + $0x58] sm:$0xff]  ;;  %v1084_v15 = vld [vmem:[%s3472_s5 + $0xc0] sm:$0xff] }
 0x250   :  { %v593_v18 = vadd.f32 %v2683_v13, %v590_v17 }
 0x252   :  { %v614_v20 = vadd.f32 %v611_v19, %v593_v18  ;;  %v1067_v19 = vld [vmem:[%s3472_s5 + $0x38] sm:$0xff] }
 0x256   :  { %v637_v21 = vpop.f32.mrf.mxu2 }
 0x257   :  { %v640_v22 = vadd.f32 %v637_v21, %v614_v20  ;;  %v1103_v20 = vld [vmem:[%s3472_s5 + $0x158] sm:$0xff] }
 0x259   :  { %v641_v23 = vmax.f32 %v640_v22, 0.0 }
 0x25b   :  { %2319 = vmatmul.msk.f32.vlgmr.msra.gmra.mxu3 %vm154_vm1, %v641_v23  ;;  %2320 = vmatmul.msk.f32.vlgmr.msra.gmra.mxu0 %vm154_vm1, %v641_v23 }
 0x25c   :  { %2321 = vmatmul.msk.f32.vlgmr.msrb.gmra.mxu1 %vm154_vm1, %v641_v23  ;;  %2322 = vmatmul.msk.f32.vlgmr.msrb.gmra.mxu2 %vm154_vm1, %v641_v23  ;;  %v1083_v23 = vld [vmem:[%s3472_s5 + $0xb8] sm:$0xff] }
 0x25d   :  { %909 = vmatpush.msrb.mxu2 %v2629_v3  ;;  %846 = vmatpush.msra.mxu3 %v2328_v26  ;;  %v2830_v3 = vpop.f32.mrf.mxu3  ;;  %v1102_v26 = vld [vmem:[%s3472_s5 + $0x150] sm:$0xff] }
 0x25e   :  { %866 = vmatpush.msra.mxu0 %v2329_v27  ;;  %886 = vmatpush.msrb.mxu1 %v2330_v28  ;;  %v1082_v27 = vld [vmem:[%s3472_s5 + $0xb0] sm:$0xff]  ;;  %v1065_v28 = vld [vmem:[%s3472_s5 + $0x28] sm:$0xff] }
 0x25f   :  { %910 = vmatpush.msrb.mxu2 %v2634_v4 }
 0x263   :  { %2323 = vmatmul.msk.f32.vlgmr.msrb.gmra.mxu3 %vm63_vm0, %v2727_v36  ;;  %2324 = vmatmul.msk.f32.vlgmr.msrb.gmra.mxu0 %vm63_vm0, %v2771_v62 }
 0x264   :  { %2326 = vmatmul.msk.f32.vlgmr.msra.gmra.mxu1 %vm63_vm0, %v2325_v24  ;;  %930 = vmatpush.msrb.mxu3 %v2615_v0 }
 0x265   :  { %956 = vmatpush.msrb.mxu0 %v2639_v5  ;;  %987 = vmatpush.msra.mxu1 %v2339_v40  ;;  %v1097_v40 = vld [vmem:[%s3472_s5 + $0x128] sm:$0xff] }
 0x266   :  { %931 = vmatpush.msrb.mxu3 %v2620_v1 }
 0x267   :  { %957 = vmatpush.msrb.mxu0 %v2648_v7  ;;  %v2337_v7 = vld [vmem:[%s3492_s20 + $0xe] sm:$0x3] }
 0x2d8   :  { %v687_v0 = vpop.f32.mrf.mxu0 }
 0x2d9   :  { %v2832_v4 = vadd.f32 %v687_v0, %v570_v14  ;;  %v707_v29 = vpop.f32.mrf.mxu1  ;;  %v1104_v14 = vld [vmem:[%s3472_s5 + $0x160] sm:$0xff]  ;;  %v1101_v0 = vld [vmem:[%s3472_s5 + $0x148] sm:$0xff] }
 0x2da   :  { %v732_v30 = vadd.f32 %v707_v29, %v571_v16  ;;  %v1109_v16 = vld [vmem:[%s3472_s5 + $0x188] sm:$0xff]  ;;  %v1064_v29 = vld [vmem:[%s3472_s5 + $0x20] sm:$0xff] }
 0x2de   :  { %v667_v31 = vpop.f32.mrf.mxu3 }
 0x2df   :  { %v2834_v32 = vadd.f32 %v667_v31, %v569_v12  ;;  %v2887_v53 = vpop.f32.mrf.mxu2  ;;  %v1068_v12 = vld [vmem:[%s3472_s5 + $0x40] sm:$0xff] }
 0x2e0   :  { %v772_v34 = vpop.f32.mrf.mxu0  ;;  %v1080_v31 = vld [vmem:[%s3472_s5 + $0xa0] sm:$0xff] }
 0x2e1   :  { %v798_v35 = vpop.f32.mrf.mxu1 }
 0x2e6   :  { %v751_v33 = vpop.f32.mrf.mxu3 }
 0x2e7   :  { %v754_v1 = vadd.f32 %v2683_v13, %v751_v33 }
 0x2e9   :  { %v775_v36 = vadd.f32 %v772_v34, %v754_v1  ;;  %v1063_v34 = vld [vmem:[%s3472_s5 + $0x18] sm:$0xff] }
 0x2ea   :  { %v1099_v1 = vld [vmem:[%s3472_s5 + $0x138] sm:$0xff] }
 0x2eb   :  { %v801_v37 = vadd.f32 %v798_v35, %v775_v36  ;;  %v1079_v36 = vld [vmem:[%s3472_s5 + $0x98] sm:$0xff] }
 0x2ed   :  { %v802_v5 = vmax.f32 %v801_v37, 0.0 }
 0x2ef   :  { %2331 = vmatmul.msk.f32.vlgmr.msra.gmra.mxu2 %vm154_vm1, %v802_v5  ;;  %2332 = vmatmul.msk.f32.vlgmr.msra.gmra.mxu3 %vm154_vm1, %v802_v5 }
 0x2f0   :  { %2333 = vmatmul.msk.f32.vlgmr.msra.gmra.mxu0 %vm154_vm1, %v802_v5  ;;  %2334 = vmatmul.msk.f32.vlgmr.msrb.gmra.mxu1 %vm154_vm1, %v802_v5  ;;  %v1062_v5 = vld [vmem:[%s3472_s5 + $0x10] sm:$0xff] }
 0x2f1   :  { %1007 = vmatpush.msra.mxu2 %v2340_v38  ;;  %1027 = vmatpush.msra.mxu3 %v2341_v39  ;;  %v1061_v39 = vld [vmem:[%s3472_s5 + $0x8] sm:$0xff] }
 0x2f2   :  { %1047 = vmatpush.msra.mxu0 %v2342_v43  ;;  %1127 = vmatpush.msrb.mxu1 %v1075_v44  ;;  %v1077_v44 = vld [vmem:[%s3472_s5 + $0x88] sm:$0xff] }
 0x2f4   :  { %1128 = vmatpush.msrb.mxu1 %v1074_v45 }
 0x2f6   :  { %1129 = vmatpush.msrb.mxu1 %v1073_v47  ;;  %v1222_v47 = vld [vmem:[%s3474_s7 + $0x78] sm:$0xff] }
 0x2f7   :  { %2335 = vmatmul.msk.f32.vlgmr.msrb.gmra.mxu2 %vm63_vm0, %v2771_v62  ;;  %2336 = vmatmul.msk.f32.vlgmr.msrb.gmra.mxu3 %vm63_vm0, %v2325_v24  ;;  %v1111_v62 = vld [vmem:[%s3472_s5 + $0x198] sm:$0xff]  ;;  %v1108_v24 = vld [vmem:[%s3472_s5 + $0x180] sm:$0xff] }
 0x2f8   :  { %2338 = vmatmul.msk.f32.vlgmr.msrb.gmra.mxu0 %vm63_vm0, %v2337_v7  ;;  %1147 = vmatpush.msrb.mxu2 %v1091_v46  ;;  %v1098_v7 = vld [vmem:[%s3472_s5 + $0x130] sm:$0xff]  ;;  %v1060_v46 = vld [vmem:[%s3472_s5] sm:$0xff] }
 0x2f9   :  { %2347 = vmatpush.msk.msrb.mxu0 %vm1123_vm2, %v1114_v52  ;;  %1130 = vmatpush.msrb.mxu1 %v1072_v50  ;;  %v1221_v50 = vld [vmem:[%s3474_s7 + $0x70] sm:$0xff] }
 0x2fa   :  { %1148 = vmatpush.msrb.mxu2 %v1090_v48  ;;  %1167 = vmatpush.msrb.mxu3 %v1107_v59  ;;  %v1238_v48 = vld [vmem:[%s3474_s7 + $0xf8] sm:$0xff]  ;;  %v1237_v52 = vld [vmem:[%s3474_s7 + $0xf0] sm:$0xff]  ;;  %v1219_v59 = vld [vmem:[%s3474_s7 + $0x60] sm:$0xff] }
 0x2fb   :  { %1197 = vmatpush.msrb.mxu0 %v1113_v55  ;;  %1131 = vmatpush.msrb.mxu1 %v1071_v54  ;;  %v1096_v54 = vld [vmem:[%s3472_s5 + $0x120] sm:$0xff]  ;;  %v1220_v55 = vld [vmem:[%s3474_s7 + $0x68] sm:$0xff] }
 0x2fc   :  { %1149 = vmatpush.msrb.mxu2 %v1089_v49  ;;  %1168 = vmatpush.msrb.mxu3 %v1106_v6  ;;  %v1076_v49 = vld [vmem:[%s3472_s5 + $0x80] sm:$0xff]  ;;  %v1234_v6 = vld [vmem:[%s3474_s7 + $0xd8] sm:$0xff] }
 0x2fd   :  { %1198 = vmatpush.msrb.mxu0 %v1112_v57  ;;  %1132 = vmatpush.msrb.mxu1 %v1070_v58  ;;  %v1236_v57 = vld [vmem:[%s3474_s7 + $0xe8] sm:$0xff]  ;;  %v1095_v58 = vld [vmem:[%s3472_s5 + $0x118] sm:$0xff] }
 0x2fe   :  { %1150 = vmatpush.msrb.mxu2 %v1088_v51  ;;  %1169 = vmatpush.msrb.mxu3 %v1105_v11  ;;  %v1254_v51 = vld [vmem:[%s3474_s7 + $0x178] sm:$0xff]  ;;  %v1233_v11 = vld [vmem:[%s3474_s7 + $0xd0] sm:$0xff] }
 0x2ff   :  { %1199 = vmatpush.msrb.mxu0 %v1111_v62  ;;  %1133 = vmatpush.msrb.mxu1 %v1069_v2  ;;  %v1218_v62 = vld [vmem:[%s3474_s7 + $0x58] sm:$0xff]  ;;  %v1251_v2 = vld [vmem:[%s3474_s7 + $0x160] sm:$0xff] }
 0x300   :  { %1151 = vmatpush.msrb.mxu2 %v1087_v56  ;;  %1170 = vmatpush.msrb.mxu3 %v1104_v14  ;;  %v1253_v56 = vld [vmem:[%s3474_s7 + $0x170] sm:$0xff] }
 0x301   :  { %1200 = vmatpush.msrb.mxu0 %v1110_v10  ;;  %1134 = vmatpush.msrb.mxu1 %v1068_v12  ;;  %v1250_v10 = vld [vmem:[%s3474_s7 + $0x158] sm:$0xff]  ;;  %v1216_v12 = vld [vmem:[%s3474_s7 + $0x48] sm:$0xff]  ;;  %v1249_v14 = vld [vmem:[%s3474_s7 + $0x150] sm:$0xff] }
 0x302   :  { %1152 = vmatpush.msrb.mxu2 %v1086_v61  ;;  %1171 = vmatpush.msrb.mxu3 %v1103_v20  ;;  %v1235_v61 = vld [vmem:[%s3474_s7 + $0xe0] sm:$0xff]  ;;  %v1213_v20 = vld [vmem:[%s3474_s7 + $0x30] sm:$0xff] }
 0x303   :  { %1201 = vmatpush.msrb.mxu0 %v1109_v16  ;;  %1135 = vmatpush.msrb.mxu1 %v1067_v19  ;;  %v1215_v16 = vld [vmem:[%s3474_s7 + $0x40] sm:$0xff]  ;;  %v1230_v19 = vld [vmem:[%s3474_s7 + $0xb8] sm:$0xff] }
 0x304   :  { %1153 = vmatpush.msrb.mxu2 %v1085_v8  ;;  %1172 = vmatpush.msrb.mxu3 %v1102_v26  ;;  %v1217_v8 = vld [vmem:[%s3474_s7 + $0x50] sm:$0xff]  ;;  %v1212_v26 = vld [vmem:[%s3474_s7 + $0x28] sm:$0xff] }
 0x305   :  { %1202 = vmatpush.msrb.mxu0 %v1108_v24  ;;  %1136 = vmatpush.msrb.mxu1 %v1066_v25  ;;  %v1248_v24 = vld [vmem:[%s3474_s7 + $0x148] sm:$0xff]  ;;  %v1094_v25 = vld [vmem:[%s3472_s5 + $0x110] sm:$0xff] }
 0x306   :  { %1154 = vmatpush.msrb.mxu2 %v1084_v15  ;;  %1173 = vmatpush.msrb.mxu3 %v1101_v0  ;;  %v1232_v15 = vld [vmem:[%s3474_s7 + $0xc8] sm:$0xff] }
 0x307   :  { %1137 = vmatpush.msrb.mxu1 %v1065_v28  ;;  %v1247_v28 = vld [vmem:[%s3474_s7 + $0x140] sm:$0xff]  ;;  %v1093_v0 = vld [vmem:[%s3472_s5 + $0x108] sm:$0xff] }
 0x308   :  { %1155 = vmatpush.msrb.mxu2 %v1083_v23  ;;  %v1229_v23 = vld [vmem:[%s3474_s7 + $0xb0] sm:$0xff] }
 0x309   :  { %1138 = vmatpush.msrb.mxu1 %v1064_v29  ;;  %v1227_v29 = vld [vmem:[%s3474_s7 + $0xa0] sm:$0xff] }
 0x30a   :  { %1156 = vmatpush.msrb.mxu2 %v1082_v27  ;;  %v1228_v27 = vld [vmem:[%s3474_s7 + $0xa8] sm:$0xff] }
 0x30b   :  { %1139 = vmatpush.msrb.mxu1 %v1063_v34  ;;  %v1245_v34 = vld [vmem:[%s3474_s7 + $0x130] sm:$0xff] }
 0x30d   :  { %1140 = vmatpush.msrb.mxu1 %v1062_v5  ;;  %v1260_v5 = vld [vmem:[%s3474_s7 + $0x1a8] sm:$0xff] }
 0x30f   :  { %1141 = vmatpush.msrb.mxu1 %v1061_v39  ;;  %v1259_v39 = vld [vmem:[%s3474_s7 + $0x1a0] sm:$0xff] }
 0x311   :  { %1142 = vmatpush.msrb.mxu1 %v1060_v46  ;;  %v1241_v46 = vld [vmem:[%s3474_s7 + $0x110] sm:$0xff] }
 0x36d   :  { %v868_v60 = vpop.f32.mrf.mxu0 }
 0x36e   :  { %v2914_v63 = vadd.f32 %v868_v60, %v732_v30  ;;  %v1100_v30 = vld [vmem:[%s3472_s5 + $0x140] sm:$0xff]  ;;  %v1252_v60 = vld [vmem:[%s3474_s7 + $0x168] sm:$0xff] }
 0x36f   :  { %1174 = vmatpush.msrb.mxu3 %v1100_v30  ;;  %v1246_v30 = vld [vmem:[%s3474_s7 + $0x138] sm:$0xff] }
 0x371   :  { %1175 = vmatpush.msrb.mxu3 %v1099_v1  ;;  %v1261_v1 = vld [vmem:[%s3474_s7 + $0x1b0] sm:$0x7] }
 0x372   :  { %v828_v17 = vpop.f32.mrf.mxu2  ;;  %v848_v18 = vpop.f32.mrf.mxu3 }
 0x373   :  { %v2950_v21 = vadd.f32 %v828_v17, %v2834_v32  ;;  %v2953_v22 = vadd.f32 %v848_v18, %v2832_v4  ;;  %v1081_v4 = vld [vmem:[%s3472_s5 + $0xa8] sm:$0xff]  ;;  %1176 = vmatpush.msrb.mxu3 %v1098_v7  ;;  %v1231_v17 = vld [vmem:[%s3474_s7 + $0xc0] sm:$0xff]  ;;  %v1214_v18 = vld [vmem:[%s3474_s7 + $0x38] sm:$0xff] }
 0x374   :  { %1157 = vmatpush.msrb.mxu2 %v1081_v4  ;;  %v1211_v4 = vld [vmem:[%s3474_s7 + $0x20] sm:$0xff]  ;;  %v1208_v7 = vld [vmem:[%s3474_s7 + $0x8] sm:$0xff] }
 0x375   :  { %v959_v37 = vpop.f32.mrf.mxu0  ;;  %1177 = vmatpush.msrb.mxu3 %v1097_v40  ;;  %v1207_v40 = vld [vmem:[%s3474_s7] sm:$0xff] }
 0x376   :  { %1158 = vmatpush.msrb.mxu2 %v1080_v31  ;;  %v1092_v31 = vld [vmem:[%s3472_s5 + $0x100] sm:$0xff] }
 0x377   :  { %1178 = vmatpush.msrb.mxu3 %v1096_v54 }
 0x378   :  { %1159 = vmatpush.msrb.mxu2 %v1079_v36  ;;  %v1225_v36 = vld [vmem:[%s3474_s7 + $0x90] sm:$0xff] }
 0x379   :  { %1179 = vmatpush.msrb.mxu3 %v1095_v58 }
 0x37a   :  { %v912_v32 = vpop.f32.mrf.mxu2  ;;  %v933_v33 = vpop.f32.mrf.mxu3 }
 0x37b   :  { %v915_v35 = vadd.f32 %v2683_v13, %v912_v32  ;;  %v1078_v13 = vld [vmem:[%s3472_s5 + $0x90] sm:$0xff]  ;;  %1180 = vmatpush.msrb.mxu3 %v1094_v25  ;;  %v1210_v32 = vld [vmem:[%s3474_s7 + $0x18] sm:$0xff]  ;;  %v2392_v25 = vld [vmem:[%s3475_s8] ss:$0 sm:$0xff] }
 0x37c   :  { %1160 = vmatpush.msrb.mxu2 %v1078_v13  ;;  %v1243_v13 = vld [vmem:[%s3474_s7 + $0x120] sm:$0xff] }
 0x37d   :  { %v936_v38 = vadd.f32 %v933_v33, %v915_v35  ;;  %1181 = vmatpush.msrb.mxu3 %v1093_v0  ;;  %v1226_v33 = vld [vmem:[%s3474_s7 + $0x98] sm:$0xff]  ;;  %v1209_v35 = vld [vmem:[%s3474_s7 + $0x10] sm:$0xff] }
 0x37e   :  { %1161 = vmatpush.msrb.mxu2 %v1077_v44  ;;  %v1242_v44 = vld [vmem:[%s3474_s7 + $0x118] sm:$0xff] }
 0x37f   :  { %v962_v43 = vadd.f32 %v959_v37, %v936_v38  ;;  %1182 = vmatpush.msrb.mxu3 %v1092_v31  ;;  %v1244_v37 = vld [vmem:[%s3474_s7 + $0x128] sm:$0xff] }
 0x380   :  { %1162 = vmatpush.msrb.mxu2 %v1076_v49  ;;  %v1224_v38 = vld [vmem:[%s3474_s7 + $0x88] sm:$0xff] }
 0x381   :  { %v963_v45 = vmax.f32 %v962_v43, 0.0  ;;  %v1223_v43 = vld [vmem:[%s3474_s7 + $0x80] sm:$0xff]  ;;  %v1256_v49 = vld [vmem:[%s3474_s7 + $0x188] sm:$0xff] }
 0x383   :  { %2343 = vmatmul.msk.f32.vlgmr.msra.gmra.mxu1 %vm154_vm1, %v963_v45  ;;  %2344 = vmatmul.msk.f32.vlgmr.msra.gmra.mxu2 %vm154_vm1, %v963_v45 }
 0x384   :  { %2345 = vmatmul.msk.f32.vlgmr.msra.gmra.mxu3 %vm154_vm1, %v963_v45  ;;  %2346 = vmatmul.msk.f32.vlgmr.msra.gmra.mxu0 %vm154_vm1, %v963_v45  ;;  %v1258_v45 = vld [vmem:[%s3474_s7 + $0x198] sm:$0xff] }
 0x385   :  { %1269 = vmatpush.msra.mxu0 %v1222_v47  ;;  %1289 = vmatpush.msra.mxu1 %v1238_v48  ;;  %v1257_v47 = vld [vmem:[%s3474_s7 + $0x190] sm:$0xff]  ;;  %v1240_v48 = vld [vmem:[%s3474_s7 + $0x108] sm:$0xff] }
 0x386   :  { %1309 = vmatpush.msra.mxu2 %v1254_v51  ;;  %2349 = vmatpush.msk.msra.mxu3 %vm1123_vm2, %v1261_v1  ;;  %v1255_v51 = vld [vmem:[%s3474_s7 + $0x180] sm:$0xff] }
 0x387   :  { %1270 = vmatpush.msra.mxu0 %v1221_v50  ;;  %1290 = vmatpush.msra.mxu1 %v1237_v52  ;;  %v1239_v50 = vld [vmem:[%s3474_s7 + $0x100] sm:$0xff]  ;;  %v242_v52 = vperm.slane %v2758_v42, 3  ;;  %s2513_s7 = smov 96  }
 0x388   :  { %1310 = vmatpush.msra.mxu2 %v1253_v56  ;;  %1339 = vmatpush.msra.mxu3 %v1260_v5  ;;  %v1355_v5 = vld [vmem:[%s3476_s9] sm:$0x3]  ;;  %s2512_s9 = smov 64  }
 0x389   :  { %1271 = vmatpush.msra.mxu0 %v1220_v55  ;;  %1291 = vmatpush.msra.mxu1 %v1236_v57  ;;  %v250_v54 = vadd.f32 %v242_v52, %v2753_v41  ;;  %v888_v55 = vpop.f32.mrf.mxu1 }
 0x38a   :  { %1311 = vmatpush.msra.mxu2 %v1252_v60  ;;  %1340 = vmatpush.msra.mxu3 %v1259_v39  ;;  %v2393_v39 = vld [vmem:[%s3480_s13] ss:$0 sm:$0xff] }
 0x38b   :  { %1272 = vmatpush.msra.mxu0 %v1219_v59  ;;  %1292 = vmatpush.msra.mxu1 %v1235_v61  ;;  %v411_v56 = vadd.f32 %v2797_v9, %v250_v54 }
 0x38c   :  { %1312 = vmatpush.msra.mxu2 %v1251_v2  ;;  %1341 = vmatpush.msra.mxu3 %v1258_v45 }
 0x38d   :  { %1273 = vmatpush.msra.mxu0 %v1218_v62  ;;  %1293 = vmatpush.msra.mxu1 %v1234_v6  ;;  %v572_v57 = vadd.f32 %v2830_v3, %v411_v56 }
 0x38e   :  { %1313 = vmatpush.msra.mxu2 %v1250_v10  ;;  %1342 = vmatpush.msra.mxu3 %v1257_v47 }
 0x38f   :  { %1274 = vmatpush.msra.mxu0 %v1217_v8  ;;  %1294 = vmatpush.msra.mxu1 %v1233_v11  ;;  %v733_v58 = vadd.f32 %v2887_v53, %v572_v57  ;;  %v1358_v53 = vlaneseq }
 0x390   :  { %1314 = vmatpush.msra.mxu2 %v1249_v14  ;;  %1343 = vmatpush.msra.mxu3 %v1256_v49 }
 0x391   :  { %1275 = vmatpush.msra.mxu0 %v1216_v12  ;;  %1295 = vmatpush.msra.mxu1 %v1232_v15  ;;  %v894_v59 = vadd.f32 %v888_v55, %v733_v58  ;;  %v1359_v12 = vand.u32 127, %v1358_v53  ;;  %v3233_v15 = vld [vmem:[%s3479_s12 + $0x18] sm:$0xff] }
 0x392   :  { %1315 = vmatpush.msra.mxu2 %v1248_v24  ;;  %1344 = vmatpush.msra.mxu3 %v1255_v51 }
 0x393   :  { %1276 = vmatpush.msra.mxu0 %v1215_v16  ;;  %1296 = vmatpush.msra.mxu1 %v1231_v17  ;;  %vm1360_vm4 = vcmp.eq.s32.totalorder %v1359_v12, 2  ;;  %v3241_v17 = vld [vmem:[%s3479_s12 + $0x10] sm:$0xff] }
 0x394   :  { %1316 = vmatpush.msra.mxu2 %v1247_v28 }
 0x395   :  { %1277 = vmatpush.msra.mxu0 %v1214_v18  ;;  %1297 = vmatpush.msra.mxu1 %v1230_v19  ;;  %v3250_v18 = vld [vmem:[%s3479_s12 + $0x8] sm:$0xff]  ;;  %v3258_v19 = vld [vmem:[%s3479_s12] sm:$0xff]  ;;  %s2256_s12 = sshll.u32 %s2516_s26, 4  ;;  %s2257_s12 = int_to_ptr.vmem [resolvable:$true] %s2256_s12 }
 0x396   :  { %1317 = vmatpush.msra.mxu2 %v1246_v30 }
 0x397   :  { %1278 = vmatpush.msra.mxu0 %v1213_v20  ;;  %1298 = vmatpush.msra.mxu1 %v1229_v23  ;;  %v2391_v20 = vld [vmem:[%s3473_s6] ss:$0 sm:$0xff] }
 0x398   :  { %1318 = vmatpush.msra.mxu2 %v1245_v34 }
 0x399   :  { %1279 = vmatpush.msra.mxu0 %v1212_v26  ;;  %1299 = vmatpush.msra.mxu1 %v1228_v27 }
 0x39a   :  { %1319 = vmatpush.msra.mxu2 %v1244_v37 }
 0x39b   :  { %1280 = vmatpush.msra.mxu0 %v1211_v4  ;;  %1300 = vmatpush.msra.mxu1 %v1227_v29 }
 0x39c   :  { %1320 = vmatpush.msra.mxu2 %v1243_v13 }
 0x39d   :  { %1281 = vmatpush.msra.mxu0 %v1210_v32  ;;  %1301 = vmatpush.msra.mxu1 %v1226_v33 }
 0x39e   :  { %1321 = vmatpush.msra.mxu2 %v1242_v44  ;;  %v1365_v44 = vld [vmem:[%s3478_s11] sm:$0x1] }
 0x39f   :  { %1282 = vmatpush.msra.mxu0 %v1209_v35  ;;  %1302 = vmatpush.msra.mxu1 %v1225_v36 }
 0x3a0   :  { %1322 = vmatpush.msra.mxu2 %v1241_v46 }
 0x3a1   :  { %1283 = vmatpush.msra.mxu0 %v1208_v7  ;;  %1303 = vmatpush.msra.mxu1 %v1224_v38 }
 0x3a2   :  { %1323 = vmatpush.msra.mxu2 %v1240_v48 }
 0x3a3   :  { %1284 = vmatpush.msra.mxu0 %v1207_v40  ;;  %1304 = vmatpush.msra.mxu1 %v1223_v43 }
 0x3a4   :  { %1324 = vmatpush.msra.mxu2 %v1239_v50 }
 0x400   :  { %v989_v60 = vpop.f32.mrf.mxu1 }
 0x401   :  { %v1052_v61 = vadd.f32 %v989_v60, %v2950_v21  ;;  %v1049_v62 = vpop.f32.mrf.mxu0  ;;  %v3218_v21 = vld [vmem:[%s3477_s10 + $0x8] sm:$0xff] }
 0x402   :  { %v1055_v2 = vadd.f32 %v1049_v62, %v894_v59 }
 0x403   :  { %v1056_v6 = vmax.f32 %v1052_v61, 0.0 }
 0x404   :  { %v1059_v42 = vmax.f32 %v1055_v2, 0.0 }
 0x405   :  { %1143 = vmatmul.f32.vlgmr.msrb.gmra.mxu1 %v1056_v6 }
 0x406   :  { %2348 = vmatmul.msk.f32.vlgmr.msrb.gmra.mxu0 %vm1119_vm3, %v1059_v42  ;;  %v1009_v8 = vpop.f32.mrf.mxu2  ;;  %1597 = vmatpush.msrb.mxu1 %v3218_v21 }
 0x407   :  { %v1053_v41 = vadd.f32 %v1009_v8, %v2953_v22  ;;  %v1029_v10 = vpop.f32.mrf.mxu3  ;;  %v2511_v22 = vmov 0.0   ;;  %1413 = vmatpush.msrb.mxu0 %v3233_v15 }
 0x408   :  { %v1054_v9 = vadd.f32 %v1029_v10, %v2914_v63  ;;  %v3225_v63 = vld [vmem:[%s3477_s10] sm:$0xff]  ;;  %v2351_v14 = vsel %vm1360_vm4, 1.0, %v2511_v22 }
 0x409   :  { %v1057_v3 = vmax.f32 %v1053_v41, 0.0  ;;  %1598 = vmatpush.msrb.mxu1 %v3225_v63  ;;  %1414 = vmatpush.msrb.mxu0 %v3241_v17  ;;  %v1469_v10 = vld [vmem:[%s3492_s20] sm:$0x3] }
 0x40a   :  { %v1058_v11 = vmax.f32 %v1054_v9, 0.0 }
 0x40b   :  { %1163 = vmatmul.f32.vlgmr.msrb.gmra.mxu2 %v1057_v3  ;;  %1415 = vmatpush.msrb.mxu0 %v3250_v18 }
 0x40c   :  { %1183 = vmatmul.f32.vlgmr.msrb.gmra.mxu3 %v1058_v11  ;;  %1625 = vmatpush.msrb.mxu2 %v3233_v15 }
 0x40d   :  { %1305 = vmatmul.f32.vlgmr.msra.gmra.mxu1 %v1057_v3  ;;  %1383 = vmatpush.msrb.mxu3 %v3218_v21 }
 0x40e   :  { %1285 = vmatmul.f32.vlgmr.msra.gmra.mxu0 %v1056_v6  ;;  %1805 = vmatpush.msra.mxu1 %v3218_v21 }
 0x40f   :  { %1384 = vmatpush.msrb.mxu3 %v3225_v63  ;;  %1626 = vmatpush.msrb.mxu2 %v3241_v17 }
 0x410   :  { %1806 = vmatpush.msra.mxu1 %v3225_v63  ;;  %1416 = vmatpush.msrb.mxu0 %v3258_v19 }
 0x411   :  { %1627 = vmatpush.msrb.mxu2 %v3250_v18 }
 0x412   :  { %1521 = vmatpush.msra.mxu0 %v3233_v15 }
 0x413   :  { %1325 = vmatmul.f32.vlgmr.msra.gmra.mxu2 %v1058_v11 }
 0x414   :  { %2350 = vmatmul.msk.f32.vlgmr.msra.gmra.mxu3 %vm1119_vm3, %v1059_v42  ;;  %1628 = vmatpush.msrb.mxu2 %v3258_v19 }
 0x415   :  { %1493 = vmatpush.msra.mxu3 %v3218_v21  ;;  %1522 = vmatpush.msra.mxu0 %v3241_v17 }
 0x416   :  { %1833 = vmatpush.msra.mxu2 %v3233_v15 }
 0x417   :  { %1494 = vmatpush.msra.mxu3 %v3225_v63  ;;  %1523 = vmatpush.msra.mxu0 %v3250_v18 }
 0x418   :  { %1834 = vmatpush.msra.mxu2 %v3241_v17 }
 0x419   :  { %1524 = vmatpush.msra.mxu0 %v3258_v19 }
 0x41a   :  { %1835 = vmatpush.msra.mxu2 %v3250_v18 }
 0x41c   :  { %2352 = vmatmul.msk.f32.vlgmr.msrb.gmra.mxu3 %vm63_vm0, %v2351_v14  ;;  %1836 = vmatpush.msra.mxu2 %v3258_v19 }
 0x41d   :  { %1701 = vmatpush.msrb.mxu3 %v3218_v21 }
 0x41f   :  { %1702 = vmatpush.msrb.mxu3 %v3225_v63 }
 0x424   :  { %2355 = vmatmul.msk.f32.vlgmr.msra.gmra.mxu3 %vm63_vm0, %v1469_v10 }
 0x425   :  { %1909 = vmatpush.msra.mxu3 %v3218_v21 }
 0x427   :  { %1910 = vmatpush.msra.mxu3 %v3225_v63 }
 0x482   :  { %v1144_v23 = vpop.f32.mrf.mxu1 }
 0x483   :  { %v1204_v16 = vpop.f32.mrf.mxu0  ;;  %v1145_v24 = vadd.f32 %v2391_v20, %v1144_v23 }
 0x48a   :  { %v1306_v31 = vpop.f32.mrf.mxu1 }
 0x48b   :  { %v1286_v26 = vpop.f32.mrf.mxu0 }
 0x48c   :  { %v1287_v4 = vadd.f32 %v2392_v25, %v1286_v26 }
 0x48e   :  { %v1164_v27 = vpop.f32.mrf.mxu2  ;;  %v1307_v32 = vadd.f32 %v1306_v31, %v1287_v4 }
 0x48f   :  { %v1165_v28 = vadd.f32 %v1164_v27, %v1145_v24  ;;  %v1184_v0 = vpop.f32.mrf.mxu3  ;;  %v2394_v24 = vld [vmem:[%s3478_s11] ss:$0 sm:$0xff] }
 0x491   :  { %v1185_v29 = vadd.f32 %v1184_v0, %v1165_v28 }
 0x493   :  { %v1205_v30 = vadd.f32 %v1204_v16, %v1185_v29  ;;  %v2395_v16 = vld [vmem:[%s3480_s13] ss:$0 sm:$0xff] }
 0x495   :  { %1353 = vst.msk [vmem:[#allocation3] sm:$0x3] %vm1352_vm5, %v1205_v30 }
 0x496   :  { %v1326_v33 = vpop.f32.mrf.mxu2 }
 0x497   :  { %v1327_v34 = vadd.f32 %v1326_v33, %v1307_v32  ;;  %v1346_v1 = vpop.f32.mrf.mxu3 }
 0x499   :  { %v1347_v35 = vadd.f32 %v1346_v1, %v1327_v34 }
 0x49b   :  { %v1349_v36 = vmul.f32 0.5, %v1347_v35 }
 0x49d   :  { %v1350_v37 = vmul.f32 1.442695, %v1349_v36 }
 0x49f   :  { %2409 = vpow2.f32 %v1350_v37  ;;  %v1386_v45 = vpop.f32.mrf.mxu3 }
 0x4a0   :  { %v1387_v46 = vadd.f32 %v1386_v45, %v1365_v44 }
 0x4a2   :  { %v1421_v47 = vperm.slane %v1387_v46, 0 }
 0x4a5   :  { %v2410_v7 = vpop.eup %2409 }
 0x4a6   :  { %v1356_v38 = vmul.f32 %v2410_v7, %v1355_v5  ;;  %1354 = vst.msk [vmem:[#allocation5] sm:$0x3] %vm1352_vm5, %v2410_v7 }
 0x4a7   :  { %v1496_v25 = vpop.f32.mrf.mxu3 }
 0x4a8   :  { %v1357_v13 = vadd.f32 %v1356_v38, %v1205_v30  ;;  %v1497_v26 = vadd.f32 %v2394_v24, %v1496_v25 }
 0x4aa   :  { %2353 = vmatmul.msk.f32.vlgmr.msrb.gmra.mxu0 %vm1397_vm6, %v1357_v13 }
 0x4ab   :  { %1729 = vmatpush.msrb.mxu0 %v3233_v15 }
 0x4ad   :  { %1730 = vmatpush.msrb.mxu0 %v3241_v17 }
 0x4af   :  { %1731 = vmatpush.msrb.mxu0 %v3250_v18 }
 0x4b1   :  { %1732 = vmatpush.msrb.mxu0 %v3258_v19 }
 0x527   :  { %v1418_v40 = vpop.f32.mrf.mxu0 }
 0x528   :  { %v1419_v43 = vadd.f32 %v2393_v39, %v1418_v40 }
 0x52a   :  { %1443 = vrot.lane.b32.xlu0 %v1419_v43, %s2512_s9  ;;  %v1422_v48 = vadd.f32 %v1421_v47, %v1419_v43 }
 0x52c   :  { %v2354_v49 = vmul.f32 -1.442695, %v1422_v48 }
 0x52e   :  { %2411 = vpow2.f32 %v2354_v49  ;;  %v2397_v49 = vld [vmem:[%s3480_s13] ss:$0 sm:$0xff] }
 0x534   :  { %v2412_v50 = vpop.eup %2411 }
 0x535   :  { %v1426_v51 = vadd.f32 1.0, %v2412_v50 }
 0x537   :  { %2413 = vrcp.f32 %v1426_v51  ;;  %v1438_v58 = vand.u32 2147483648, %v1426_v51  ;;  %vm1432_vm8 = vweird.f32 %v1426_v51  ;;  %v1436_v59 = vand.u32 2147483647, %v1426_v51 }
 0x539   :  { %v1439_v61 = vor.u32 1.1754944e-38, %v1438_v58  ;;  %vm1437_vm10 = vcmp.eq.f32.partialorder %v1436_v59, 8.507059e+37 }
 0x53d   :  { %v2414_v52 = vpop.eup %2413 }
 0x53e   :  { %v1428_v54 = vmul.f32 %v2414_v52, %v1426_v51  ;;  %vm1433_vm7 = vweird.f32 %v2414_v52 }
 0x53f   :  { %vm1434_vm9 = vmor %vm1432_vm8, %vm1433_vm7 }
 0x540   :  { %v1429_v55 = vsub.f32 1.0, %v1428_v54 }
 0x542   :  { %v1430_v56 = vmul.f32 %v2414_v52, %v1429_v55 }
 0x544   :  { %v1431_v57 = vadd.f32 %v2414_v52, %v1430_v56 }
 0x546   :  { %v1435_v60 = vsel %vm1434_vm9, %v2414_v52, %v1431_v57  ;;  %v2396_v52 = vld [vmem:[%s3478_s11] ss:$0 sm:$0xff] }
 0x547   :  { %v1440_v2 = vsel %vm1437_vm10, %v1439_v61, %v1435_v60 }
 0x548   :  { %v1453_v3 = vsub.f32 1.0, %v1440_v2 }
 0x59c   :  { %v1444_v62 = vpop.permute.xlu0 %1443 }
 0x59d   :  { %v1446_v6 = vmul.f32 %v1444_v62, %v1440_v2 }
 0x59f   :  { %1448 = vrot.lane.b32.xlu0 %v1446_v6, %s2512_s9 }
 0x611   :  { %v1449_v42 = vpop.permute.xlu0 %1448 }
 0x612   :  { %v1451_v8 = vadd.f32 %v1449_v42, %v1421_v47  ;;  %v2358_v47 = vld [vmem:[%s3492_s20 + $0x2] sm:$0x3] }
 0x613   :  { %2359 = vmatmul.msk.f32.vlgmr.msrb.gmra.mxu1 %vm63_vm0, %v2358_v47 }
 0x614   :  { %2415 = vtanh.f32 %v1451_v8  ;;  %2013 = vmatpush.msrb.mxu1 %v3218_v21 }
 0x616   :  { %2014 = vmatpush.msrb.mxu1 %v3225_v63 }
 0x61a   :  { %v2416_v41 = vpop.eup %2415 }
 0x61b   :  { %1455 = vrot.lane.b32.xlu1 %v2416_v41, %s2513_s7 }
 0x623   :  { %1459 = vrot.lane.b32.xlu1 %v1357_v13, %s2514_s0 }
 0x68d   :  { %v1456_v9 = vpop.permute.xlu1 %1455 }
 0x68e   :  { %v1458_v53 = vmul.f32 %v1456_v9, %v1453_v3 }
 0x690   :  { %v1600_v54 = vpop.f32.mrf.mxu1 }
 0x691   :  { %v1601_v55 = vadd.f32 %v2396_v52, %v1600_v54  ;;  %v2199_v52 = vld [vmem:[%s3481_s14] sm:$0xff] }
 0x695   :  { %v1460_v11 = vpop.permute.xlu1 %1459 }
 0x696   :  { %v1462_v12 = vmul.f32 %v1460_v11, %v1440_v2 }
 0x698   :  { %v1463_v22 = vadd.f32 %v1462_v12, %v1458_v53 }
 0x69a   :  { %1465 = vrot.lane.b32.xlu2 %v1463_v22, %s2513_s7 }
 0x6f4   :  { %v1466_v14 = vpop.permute.xlu2 %1465 }
 0x6f5   :  { %1468 = vst.msk [vmem:[#allocation2] sm:$0x3] %vm1352_vm5, %v1466_v14  ;;  %2356 = vmatmul.msk.f32.vlgmr.msra.gmra.mxu0 %vm1397_vm6, %v1466_v14  ;;  %v2362_v14 = vld [vmem:[%s3492_s20 + $0x4] sm:$0x3] }
 0x6f6   :  { %1937 = vmatpush.msra.mxu0 %v3233_v15  ;;  %2363 = vmatmul.msk.f32.vlgmr.msrb.gmra.mxu3 %vm63_vm0, %v2362_v14 }
 0x6f7   :  { %2117 = vmatpush.msrb.mxu3 %v3218_v21  ;;  %v2399_v21 = vld [vmem:[%s3480_s13] ss:$0 sm:$0xff] }
 0x6f8   :  { %1938 = vmatpush.msra.mxu0 %v3241_v17 }
 0x6f9   :  { %2118 = vmatpush.msrb.mxu3 %v3225_v63 }
 0x6fa   :  { %1939 = vmatpush.msra.mxu0 %v3250_v18 }
 0x6fc   :  { %1940 = vmatpush.msra.mxu0 %v3258_v19 }
 0x772   :  { %v1526_v20 = vpop.f32.mrf.mxu0 }
 0x773   :  { %v1527_v23 = vadd.f32 %v2395_v16, %v1526_v20 }
 0x775   :  { %1550 = vrot.lane.b32.xlu2 %v1527_v23, %s2512_s9  ;;  %v1529_v27 = vadd.f32 %v1527_v23, %v1497_v26 }
 0x777   :  { %v2357_v28 = vmul.f32 -1.442695, %v1529_v27 }
 0x779   :  { %2417 = vpow2.f32 %v2357_v28  ;;  %v2398_v28 = vld [vmem:[%s3478_s11] ss:$0 sm:$0xff] }
 0x77f   :  { %v2418_v0 = vpop.eup %2417 }
 0x780   :  { %v1533_v4 = vadd.f32 1.0, %v2418_v0  ;;  %v1704_v0 = vpop.f32.mrf.mxu3 }
 0x782   :  { %2419 = vrcp.f32 %v1533_v4  ;;  %v1545_v34 = vand.u32 2147483648, %v1533_v4  ;;  %vm1539_vm12 = vweird.f32 %v1533_v4  ;;  %v1543_v1 = vand.u32 2147483647, %v1533_v4 }
 0x784   :  { %v1546_v36 = vor.u32 1.1754944e-38, %v1545_v34  ;;  %vm1544_vm14 = vcmp.eq.f32.partialorder %v1543_v1, 8.507059e+37 }
 0x788   :  { %v2420_v29 = vpop.eup %2419 }
 0x789   :  { %v1535_v30 = vmul.f32 %v2420_v29, %v1533_v4  ;;  %vm1540_vm11 = vweird.f32 %v2420_v29 }
 0x78a   :  { %vm1541_vm13 = vmor %vm1539_vm12, %vm1540_vm11 }
 0x78b   :  { %v1536_v31 = vsub.f32 1.0, %v1535_v30 }
 0x78d   :  { %v1537_v32 = vmul.f32 %v2420_v29, %v1536_v31 }
 0x78f   :  { %v1538_v33 = vadd.f32 %v2420_v29, %v1537_v32 }
 0x791   :  { %v1542_v35 = vsel %vm1541_vm13, %v2420_v29, %v1538_v33 }
 0x792   :  { %v1547_v5 = vsel %vm1544_vm14, %v1546_v36, %v1542_v35 }
 0x793   :  { %v1560_v40 = vsub.f32 1.0, %v1547_v5  ;;  %v1566_v44 = vmul.f32 %v1547_v5, %v1463_v22 }
 0x7cf   :  { %v1551_v37 = vpop.permute.xlu2 %1550 }
 0x7d0   :  { %v1553_v7 = vmul.f32 %v1551_v37, %v1547_v5 }
 0x7d2   :  { %1555 = vrot.lane.b32.xlu0 %v1553_v7, %s2512_s9 }
 0x844   :  { %v1556_v38 = vpop.permute.xlu0 %1555 }
 0x845   :  { %v1558_v13 = vadd.f32 %v1556_v38, %v1497_v26 }
 0x847   :  { %2421 = vtanh.f32 %v1558_v13 }
 0x84d   :  { %v2422_v39 = vpop.eup %2421 }
 0x84e   :  { %1562 = vrot.lane.b32.xlu1 %v2422_v39, %s2513_s7 }
 0x8c0   :  { %v1563_v43 = vpop.permute.xlu1 %1562 }
 0x8c1   :  { %v1565_v45 = vmul.f32 %v1563_v43, %v1560_v40  ;;  %v2366_v40 = vld [vmem:[%s3492_s20 + $0x6] sm:$0x3] }
 0x8c2   :  { %2367 = vmatmul.msk.f32.vlgmr.msra.gmra.mxu1 %vm63_vm0, %v2366_v40 }
 0x8c3   :  { %v1567_v46 = vadd.f32 %v1566_v44, %v1565_v45 }
 0x8c5   :  { %1569 = vrot.lane.b32.xlu2 %v1567_v46, %s2513_s7 }
 0x91f   :  { %v1570_v48 = vpop.permute.xlu2 %1569 }
 0x920   :  { %1572 = vst.msk [vmem:[#allocation2 + $0x2] sm:$0x3] %vm1352_vm5, %v1570_v48  ;;  %2360 = vmatmul.msk.f32.vlgmr.msrb.gmra.mxu2 %vm1397_vm6, %v1570_v48  ;;  %v2374_v48 = vld [vmem:[%s3492_s20 + $0xa] sm:$0x3] }
 0x921   :  { %2041 = vmatpush.msrb.mxu2 %v3233_v15  ;;  %2375 = vmatmul.msk.f32.vlgmr.msrb.gmra.mxu1 %vm63_vm0, %v2374_v48 }
 0x923   :  { %2042 = vmatpush.msrb.mxu2 %v3241_v17 }
 0x925   :  { %2043 = vmatpush.msrb.mxu2 %v3250_v18 }
 0x927   :  { %2044 = vmatpush.msrb.mxu2 %v3258_v19 }
 0x9a3   :  { %v1630_v50 = vpop.f32.mrf.mxu2 }
 0x9a4   :  { %v1631_v51 = vadd.f32 %v2397_v49, %v1630_v50  ;;  %v2202_v49 = vld [vmem:[%s3481_s14 + $0x18] sm:$0xff]  ;;  %v2201_v50 = vld [vmem:[%s3481_s14 + $0x10] sm:$0xff] }
 0x9a5   :  { %2225 = vmatpush.msra.mxu1 %v2202_v49 }
 0x9a6   :  { %1654 = vrot.lane.b32.xlu0 %v1631_v51, %s2512_s9  ;;  %v1633_v56 = vadd.f32 %v1631_v51, %v1601_v55  ;;  %v2200_v51 = vld [vmem:[%s3481_s14 + $0x8] sm:$0xff] }
 0x9a7   :  { %2226 = vmatpush.msra.mxu1 %v2201_v50 }
 0x9a8   :  { %v2361_v57 = vmul.f32 -1.442695, %v1633_v56  ;;  %v1808_v56 = vpop.f32.mrf.mxu1 }
 0x9a9   :  { %2227 = vmatpush.msra.mxu1 %v2200_v51 }
 0x9aa   :  { %2423 = vpow2.f32 %v2361_v57 }
 0x9ab   :  { %2228 = vmatpush.msra.mxu1 %v2199_v52 }
 0x9b0   :  { %v2424_v58 = vpop.eup %2423  ;;  %v3387_v57 = vpop.f32.mrf.mxu1 }
 0x9b1   :  { %v1637_v59 = vadd.f32 1.0, %v2424_v58  ;;  %v2402_v58 = vld [vmem:[%s3480_s13] ss:$0 sm:$0xff] }
 0x9b3   :  { %2425 = vrcp.f32 %v1637_v59  ;;  %v1649_v42 = vand.u32 2147483648, %v1637_v59  ;;  %vm1643_vm1 = vweird.f32 %v1637_v59  ;;  %v1647_v8 = vand.u32 2147483647, %v1637_v59 }
 0x9b5   :  { %v1650_v10 = vor.u32 1.1754944e-38, %v1649_v42  ;;  %vm1648_vm3 = vcmp.eq.f32.partialorder %v1647_v8, 8.507059e+37 }
 0x9b9   :  { %v2426_v60 = vpop.eup %2425 }
 0x9ba   :  { %v1639_v61 = vmul.f32 %v2426_v60, %v1637_v59  ;;  %vm1644_vm15 = vweird.f32 %v2426_v60  ;;  %v3395_v59 = vld [vmem:[%s3482_s15] ss:$0 sm:$0xff] }
 0x9bb   :  { %vm1645_vm2 = vmor %vm1643_vm1, %vm1644_vm15 }
 0x9bc   :  { %v1640_v62 = vsub.f32 1.0, %v1639_v61 }
 0x9be   :  { %v1641_v2 = vmul.f32 %v2426_v60, %v1640_v62 }
 0x9c0   :  { %v1642_v6 = vadd.f32 %v2426_v60, %v1641_v2 }
 0x9c2   :  { %v1646_v41 = vsel %vm1645_vm2, %v2426_v60, %v1642_v6  ;;  %v2400_v6 = vld [vmem:[%s3478_s11] ss:$0 sm:$0xff] }
 0x9c3   :  { %v1651_v3 = vsel %vm1648_vm3, %v1650_v10, %v1646_v41  ;;  %v1809_v42 = vadd.f32 %v2400_v6, %v1808_v56  ;;  %v2401_v6 = vld [vmem:[%s3478_s11] ss:$0 sm:$0xff] }
 0x9c4   :  { %v1664_v16 = vsub.f32 1.0, %v1651_v3  ;;  %v1670_v23 = vmul.f32 %v1651_v3, %v1567_v46 }
 0xa18   :  { %v1655_v9 = vpop.permute.xlu0 %1654 }
 0xa19   :  { %v1657_v11 = vmul.f32 %v1655_v9, %v1651_v3 }
 0xa1b   :  { %1659 = vrot.lane.b32.xlu1 %v1657_v11, %s2512_s9 }
 0xa8d   :  { %v1660_v53 = vpop.permute.xlu1 %1659 }
 0xa8e   :  { %v1662_v12 = vadd.f32 %v1660_v53, %v1601_v55 }
 0xa90   :  { %2427 = vtanh.f32 %v1662_v12 }
 0xa96   :  { %v2428_v22 = vpop.eup %2427 }
 0xa97   :  { %1666 = vrot.lane.b32.xlu2 %v2428_v22, %s2513_s7 }
 0xaf1   :  { %v1667_v20 = vpop.permute.xlu2 %1666 }
 0xaf2   :  { %v1669_v24 = vmul.f32 %v1667_v20, %v1664_v16 }
 0xaf4   :  { %v1671_v25 = vadd.f32 %v1670_v23, %v1669_v24 }
 0xaf6   :  { %1673 = vrot.lane.b32.xlu0 %v1671_v25, %s2513_s7 }
 0xb68   :  { %v1674_v26 = vpop.permute.xlu0 %1673 }
 0xb69   :  { %1676 = vst.msk [vmem:[#allocation2 + $0x4] sm:$0x3] %vm1352_vm5, %v1674_v26  ;;  %2364 = vmatmul.msk.f32.vlgmr.msrb.gmra.mxu0 %vm1397_vm6, %v1674_v26 }
 0xb6a   :  { %2145 = vmatpush.msrb.mxu0 %v3233_v15  ;;  %v1705_v15 = vadd.f32 %v2398_v28, %v1704_v0  ;;  %v2370_v28 = vld [vmem:[%s3492_s20 + $0x8] sm:$0x3] }
 0xb6b   :  { %2371 = vmatmul.msk.f32.vlgmr.msra.gmra.mxu3 %vm63_vm0, %v2370_v28 }
 0xb6c   :  { %2146 = vmatpush.msrb.mxu0 %v3241_v17 }
 0xb6e   :  { %2147 = vmatpush.msrb.mxu0 %v3250_v18 }
 0xb70   :  { %2148 = vmatpush.msrb.mxu0 %v3258_v19 }
 0xbe6   :  { %v1734_v63 = vpop.f32.mrf.mxu0 }
 0xbe7   :  { %v1735_v27 = vadd.f32 %v2399_v21, %v1734_v63 }
 0xbe9   :  { %1758 = vrot.lane.b32.xlu1 %v1735_v27, %s2512_s9  ;;  %v1737_v4 = vadd.f32 %v1735_v27, %v1705_v15 }
 0xbeb   :  { %v2365_v17 = vmul.f32 -1.442695, %v1737_v4 }
 0xbed   :  { %2429 = vpow2.f32 %v2365_v17 }
 0xbf3   :  { %v2430_v18 = vpop.eup %2429 }
 0xbf4   :  { %v1741_v29 = vadd.f32 1.0, %v2430_v18 }
 0xbf6   :  { %2431 = vrcp.f32 %v1741_v29  ;;  %v1753_v34 = vand.u32 2147483648, %v1741_v29  ;;  %vm1747_vm7 = vweird.f32 %v1741_v29  ;;  %v1751_v1 = vand.u32 2147483647, %v1741_v29 }
 0xbf8   :  { %v1754_v36 = vor.u32 1.1754944e-38, %v1753_v34  ;;  %vm1752_vm9 = vcmp.eq.f32.partialorder %v1751_v1, 8.507059e+37 }
 0xbfc   :  { %v2432_v19 = vpop.eup %2431 }
 0xbfd   :  { %v1743_v30 = vmul.f32 %v2432_v19, %v1741_v29  ;;  %vm1748_vm4 = vweird.f32 %v2432_v19 }
 0xbfe   :  { %vm1749_vm8 = vmor %vm1747_vm7, %vm1748_vm4 }
 0xbff   :  { %v1744_v31 = vsub.f32 1.0, %v1743_v30 }
 0xc01   :  { %v1745_v32 = vmul.f32 %v2432_v19, %v1744_v31 }
 0xc03   :  { %v1746_v33 = vadd.f32 %v2432_v19, %v1745_v32  ;;  %v2404_v32 = vld [vmem:[%s3478_s11] ss:$0 sm:$0xff] }
 0xc05   :  { %v1750_v35 = vsel %vm1749_vm8, %v2432_v19, %v1746_v33  ;;  %v2405_v19 = vld [vmem:[%s3480_s13] ss:$0 sm:$0xff]  ;;  %v1912_v33 = vpop.f32.mrf.mxu3 }
 0xc06   :  { %v1755_v5 = vsel %vm1752_vm9, %v1754_v36, %v1750_v35  ;;  %v1913_v34 = vadd.f32 %v2404_v32, %v1912_v33 }
 0xc07   :  { %v1768_v43 = vsub.f32 1.0, %v1755_v5  ;;  %v1774_v45 = vmul.f32 %v1755_v5, %v1671_v25 }
 0xc5b   :  { %v1759_v37 = vpop.permute.xlu1 %1758 }
 0xc5c   :  { %v1761_v7 = vmul.f32 %v1759_v37, %v1755_v5 }
 0xc5e   :  { %1763 = vrot.lane.b32.xlu2 %v1761_v7, %s2512_s9 }
 0xcb8   :  { %v1764_v38 = vpop.permute.xlu2 %1763 }
 0xcb9   :  { %v1766_v13 = vadd.f32 %v1764_v38, %v1705_v15 }
 0xcbb   :  { %2433 = vtanh.f32 %v1766_v13 }
 0xcc1   :  { %v2434_v39 = vpop.eup %2433 }
 0xcc2   :  { %1770 = vrot.lane.b32.xlu0 %v2434_v39, %s2513_s7 }
 0xd34   :  { %v1771_v44 = vpop.permute.xlu0 %1770 }
 0xd35   :  { %v1773_v46 = vmul.f32 %v1771_v44, %v1768_v43 }
 0xd37   :  { %v1775_v47 = vadd.f32 %v1774_v45, %v1773_v46 }
 0xd39   :  { %1777 = vrot.lane.b32.xlu1 %v1775_v47, %s2513_s7 }
 0xdab   :  { %v1778_v54 = vpop.permute.xlu1 %1777 }
 0xdac   :  { %1780 = vst.msk [vmem:[#allocation2 + $0x6] sm:$0x3] %vm1352_vm5, %v1778_v54  ;;  %2368 = vmatmul.msk.f32.vlgmr.msra.gmra.mxu2 %vm1397_vm6, %v1778_v54 }
 0xdb3   :  { %v2197_v55 = vld [vmem:[#allocation2] sm:$0xff] }
 0xdb4   :  { %2382 = vmatmul.msk.f32.vlgmr.msra.gmra.mxu1 %vm1397_vm6, %v2197_v55 }
 0xe2f   :  { %v1838_v60 = vpop.f32.mrf.mxu2 }
 0xe30   :  { %v1839_v61 = vadd.f32 %v2402_v58, %v1838_v60 }
 0xe31   :  { %v2230_v62 = vpop.f32.mrf.mxu1 }
 0xe32   :  { %v2231_v2 = vadd.f32 %v3395_v59, %v2230_v62  ;;  %1862 = vrot.lane.b32.xlu2 %v1839_v61, %s2512_s9  ;;  %v1841_v8 = vadd.f32 %v1839_v61, %v1809_v42  ;;  %v2406_v61 = vld [vmem:[%s3480_s13] ss:$0 sm:$0xff] }
 0xe34   :  { %2236 = vst.msk [vmem:[%s3483_s16] sm:$0xff] %vm63_vm0, %v2231_v2  ;;  %v2369_v41 = vmul.f32 -1.442695, %v1841_v8 }
 0xe36   :  { %2435 = vpow2.f32 %v2369_v41 }
 0xe3c   :  { %v2436_v10 = vpop.eup %2435 }
 0xe3d   :  { %v1845_v9 = vadd.f32 1.0, %v2436_v10 }
 0xe3f   :  { %2437 = vrcp.f32 %v1845_v9  ;;  %v1857_v14 = vand.u32 2147483648, %v1845_v9  ;;  %vm1851_vm11 = vweird.f32 %v1845_v9  ;;  %v1855_v16 = vand.u32 2147483647, %v1845_v9 }
 0xe41   :  { %v1858_v23 = vor.u32 1.1754944e-38, %v1857_v14  ;;  %vm1856_vm13 = vcmp.eq.f32.partialorder %v1855_v16, 8.507059e+37 }
 0xe45   :  { %v2438_v3 = vpop.eup %2437 }
 0xe46   :  { %v1847_v11 = vmul.f32 %v2438_v3, %v1845_v9  ;;  %vm1852_vm10 = vweird.f32 %v2438_v3 }
 0xe47   :  { %vm1853_vm12 = vmor %vm1851_vm11, %vm1852_vm10 }
 0xe48   :  { %v1848_v53 = vsub.f32 1.0, %v1847_v11 }
 0xe4a   :  { %v1849_v12 = vmul.f32 %v2438_v3, %v1848_v53 }
 0xe4c   :  { %v1850_v22 = vadd.f32 %v2438_v3, %v1849_v12 }
 0xe4e   :  { %v1854_v20 = vsel %vm1853_vm12, %v2438_v3, %v1850_v22 }
 0xe4f   :  { %v1859_v25 = vsel %vm1856_vm13, %v1858_v23, %v1854_v20 }
 0xe50   :  { %v1872_v0 = vsub.f32 1.0, %v1859_v25  ;;  %v1878_v4 = vmul.f32 %v1859_v25, %v1775_v47 }
 0xe8c   :  { %v1863_v24 = vpop.permute.xlu2 %1862 }
 0xe8d   :  { %v1865_v26 = vmul.f32 %v1863_v24, %v1859_v25 }
 0xe8f   :  { %1867 = vrot.lane.b32.xlu0 %v1865_v26, %s2512_s9 }
 0xf01   :  { %v1868_v21 = vpop.permute.xlu0 %1867 }
 0xf02   :  { %v1870_v63 = vadd.f32 %v1868_v21, %v1809_v42  ;;  %v2017_v42 = vadd.f32 %v2401_v6, %v3387_v57 }
 0xf04   :  { %2439 = vtanh.f32 %v1870_v63 }
 0xf0a   :  { %v2440_v27 = vpop.eup %2439 }
 0xf0b   :  { %1874 = vrot.lane.b32.xlu1 %v2440_v27, %s2513_s7  ;;  %v2378_v27 = vld [vmem:[%s3492_s20 + $0xc] sm:$0x3] }
 0xf0c   :  { %2379 = vmatmul.msk.f32.vlgmr.msrb.gmra.mxu3 %vm63_vm0, %v2378_v27 }
 0xf7d   :  { %v1875_v15 = vpop.permute.xlu1 %1874 }
 0xf7e   :  { %v1877_v17 = vmul.f32 %v1875_v15, %v1872_v0 }
 0xf80   :  { %v1879_v18 = vadd.f32 %v1878_v4, %v1877_v17 }
 0xf82   :  { %1881 = vrot.lane.b32.xlu2 %v1879_v18, %s2513_s7 }
 0xf8f   :  { %v2120_v32 = vpop.f32.mrf.mxu3 }
 0xfdc   :  { %v1882_v29 = vpop.permute.xlu2 %1881 }
 0xfdd   :  { %1884 = vst.msk [vmem:[#allocation2 + $0x8] sm:$0x3] %vm1352_vm5, %v1882_v29  ;;  %2372 = vmatmul.msk.f32.vlgmr.msra.gmra.mxu0 %vm1397_vm6, %v1882_v29  ;;  %v2408_v29 = vld [vmem:[%s3480_s13] ss:$0 sm:$0xff] }
0x105a   :  { %v1942_v30 = vpop.f32.mrf.mxu0 }
0x105b   :  { %v1943_v31 = vadd.f32 %v2405_v19, %v1942_v30 }
0x105d   :  { %1966 = vrot.lane.b32.xlu0 %v1943_v31, %s2512_s9  ;;  %v1945_v1 = vadd.f32 %v1943_v31, %v1913_v34  ;;  %v2407_v31 = vld [vmem:[%s3478_s11] ss:$0 sm:$0xff]  ;;  %s2515_s11 = smov [#allocation3]  }
0x105e   :  { %v2121_v33 = vadd.f32 %v2407_v31, %v2120_v32  ;;  %s2245_s13 = sshll.u32 %s2515_s11, 4  ;;  %s2246_s13 = int_to_ptr.vmem [resolvable:$true] %s2245_s13 }
0x105f   :  { %v2373_v35 = vmul.f32 -1.442695, %v1945_v1  ;;  %2250 = dma.vmem_to_hbm [thread:$0]  %s2246_s13, 32, %s2248_s25, [#allocation4]  }
0x1061   :  { %2441 = vpow2.f32 %v2373_v35 }
0x1067   :  { %v2442_v36 = vpop.eup %2441 }
0x1068   :  { %v1949_v37 = vadd.f32 1.0, %v2442_v36 }
0x106a   :  { %2443 = vrcp.f32 %v1949_v37  ;;  %v1961_v40 = vand.u32 2147483648, %v1949_v37  ;;  %vm1955_vm15 = vweird.f32 %v1949_v37  ;;  %v1959_v43 = vand.u32 2147483647, %v1949_v37 }
0x106c   :  { %v1962_v45 = vor.u32 1.1754944e-38, %v1961_v40  ;;  %vm1960_vm2 = vcmp.eq.f32.partialorder %v1959_v43, 8.507059e+37 }
0x1070   :  { %v2444_v5 = vpop.eup %2443 }
0x1071   :  { %v1951_v7 = vmul.f32 %v2444_v5, %v1949_v37  ;;  %vm1956_vm14 = vweird.f32 %v2444_v5 }
0x1072   :  { %vm1957_vm1 = vmor %vm1955_vm15, %vm1956_vm14 }
0x1073   :  { %v1952_v38 = vsub.f32 1.0, %v1951_v7 }
0x1075   :  { %v1953_v13 = vmul.f32 %v2444_v5, %v1952_v38 }
0x1077   :  { %v1954_v39 = vadd.f32 %v2444_v5, %v1953_v13 }
0x1079   :  { %v1958_v44 = vsel %vm1957_vm1, %v2444_v5, %v1954_v39 }
0x107a   :  { %v1963_v47 = vsel %vm1960_vm2, %v1962_v45, %v1958_v44 }
0x107b   :  { %v1976_v52 = vsub.f32 1.0, %v1963_v47  ;;  %v1982_v55 = vmul.f32 %v1963_v47, %v1879_v18 }
0x10cf   :  { %v1967_v46 = vpop.permute.xlu0 %1966 }
0x10d0   :  { %v1969_v48 = vmul.f32 %v1967_v46, %v1963_v47 }
0x10d2   :  { %1971 = vrot.lane.b32.xlu1 %v1969_v48, %s2512_s9 }
0x1144   :  { %v1972_v49 = vpop.permute.xlu1 %1971 }
0x1145   :  { %v1974_v50 = vadd.f32 %v1972_v49, %v1913_v34 }
0x1147   :  { %2445 = vtanh.f32 %v1974_v50 }
0x114d   :  { %v2446_v51 = vpop.eup %2445 }
0x114e   :  { %1978 = vrot.lane.b32.xlu2 %v2446_v51, %s2513_s7 }
0x11a8   :  { %v1979_v54 = vpop.permute.xlu2 %1978 }
0x11a9   :  { %v1981_v56 = vmul.f32 %v1979_v54, %v1976_v52 }
0x11ab   :  { %v1983_v58 = vadd.f32 %v1982_v55, %v1981_v56 }
0x11ad   :  { %1985 = vrot.lane.b32.xlu0 %v1983_v58, %s2513_s7 }
0x121f   :  { %v1986_v60 = vpop.permute.xlu0 %1985 }
0x1220   :  { %1988 = vst.msk [vmem:[#allocation2 + $0xa] sm:$0x3] %vm1352_vm5, %v1986_v60  ;;  %2376 = vmatmul.msk.f32.vlgmr.msrb.gmra.mxu2 %vm1397_vm6, %v1986_v60 }
0x12a3   :  { %v2046_v62 = vpop.f32.mrf.mxu2 }
0x12a4   :  { %v2047_v2 = vadd.f32 %v2406_v61, %v2046_v62 }
0x12a6   :  { %2070 = vrot.lane.b32.xlu1 %v2047_v2, %s2512_s9  ;;  %v2049_v8 = vadd.f32 %v2047_v2, %v2017_v42 }
0x12a8   :  { %v2377_v41 = vmul.f32 -1.442695, %v2049_v8 }
0x12aa   :  { %2447 = vpow2.f32 %v2377_v41 }
0x12b0   :  { %v2448_v10 = vpop.eup %2447 }
0x12b1   :  { %v2053_v9 = vadd.f32 1.0, %v2448_v10 }
0x12b3   :  { %2449 = vrcp.f32 %v2053_v9  ;;  %v2065_v14 = vand.u32 2147483648, %v2053_v9  ;;  %vm2059_vm4 = vweird.f32 %v2053_v9  ;;  %v2063_v16 = vand.u32 2147483647, %v2053_v9 }
0x12b5   :  { %v2066_v23 = vor.u32 1.1754944e-38, %v2065_v14  ;;  %vm2064_vm8 = vcmp.eq.f32.partialorder %v2063_v16, 8.507059e+37 }
0x12b9   :  { %v2450_v3 = vpop.eup %2449 }
0x12ba   :  { %v2055_v11 = vmul.f32 %v2450_v3, %v2053_v9  ;;  %vm2060_vm3 = vweird.f32 %v2450_v3 }
0x12bb   :  { %vm2061_vm7 = vmor %vm2059_vm4, %vm2060_vm3 }
0x12bc   :  { %v2056_v53 = vsub.f32 1.0, %v2055_v11 }
0x12be   :  { %v2057_v12 = vmul.f32 %v2450_v3, %v2056_v53 }
0x12c0   :  { %v2058_v22 = vadd.f32 %v2450_v3, %v2057_v12 }
0x12c2   :  { %v2062_v20 = vsel %vm2061_vm7, %v2450_v3, %v2058_v22 }
0x12c3   :  { %v2067_v24 = vsel %vm2064_vm8, %v2066_v23, %v2062_v20 }
0x12c4   :  { %v2080_v28 = vsub.f32 1.0, %v2067_v24  ;;  %v2086_v15 = vmul.f32 %v2067_v24, %v1983_v58 }
0x1318   :  { %v2071_v57 = vpop.permute.xlu1 %2070 }
0x1319   :  { %v2073_v25 = vmul.f32 %v2071_v57, %v2067_v24 }
0x131b   :  { %2075 = vrot.lane.b32.xlu2 %v2073_v25, %s2512_s9 }
0x1375   :  { %v2076_v26 = vpop.permute.xlu2 %2075 }
0x1376   :  { %v2078_v21 = vadd.f32 %v2076_v26, %v2017_v42 }
0x1378   :  { %2451 = vtanh.f32 %v2078_v21 }
0x137e   :  { %v2452_v63 = vpop.eup %2451 }
0x137f   :  { %2082 = vrot.lane.b32.xlu0 %v2452_v63, %s2513_s7 }
0x13f1   :  { %v2083_v0 = vpop.permute.xlu0 %2082 }
0x13f2   :  { %v2085_v4 = vmul.f32 %v2083_v0, %v2080_v28 }
0x13f4   :  { %v2087_v17 = vadd.f32 %v2086_v15, %v2085_v4 }
0x13f6   :  { %2089 = vrot.lane.b32.xlu1 %v2087_v17, %s2513_s7 }
0x1468   :  { %v2090_v18 = vpop.permute.xlu1 %2089 }
0x1469   :  { %2092 = vst.msk [vmem:[#allocation2 + $0xc] sm:$0x3] %vm1352_vm5, %v2090_v18  ;;  %2380 = vmatmul.msk.f32.vlgmr.msrb.gmra.mxu0 %vm1397_vm6, %v2090_v18 }
0x14e6   :  { %v2150_v19 = vpop.f32.mrf.mxu0 }
0x14e7   :  { %v2151_v30 = vadd.f32 %v2408_v29, %v2150_v19 }
0x14e9   :  { %2174 = vrot.lane.b32.xlu2 %v2151_v30, %s2512_s9  ;;  %v2153_v34 = vadd.f32 %v2151_v30, %v2121_v33 }
0x14eb   :  { %v2381_v1 = vmul.f32 -1.442695, %v2153_v34 }
0x14ed   :  { %2453 = vpow2.f32 %v2381_v1 }
0x14f3   :  { %v2454_v35 = vpop.eup %2453 }
0x14f4   :  { %v2157_v36 = vadd.f32 1.0, %v2454_v35 }
0x14f6   :  { %2455 = vrcp.f32 %v2157_v36  ;;  %v2169_v39 = vand.u32 2147483648, %v2157_v36  ;;  %vm2163_vm10 = vweird.f32 %v2157_v36  ;;  %v2167_v40 = vand.u32 2147483647, %v2157_v36 }
0x14f8   :  { %v2170_v44 = vor.u32 1.1754944e-38, %v2169_v39  ;;  %vm2168_vm12 = vcmp.eq.f32.partialorder %v2167_v40, 8.507059e+37 }
0x14fc   :  { %v2456_v37 = vpop.eup %2455 }
0x14fd   :  { %v2159_v5 = vmul.f32 %v2456_v37, %v2157_v36  ;;  %vm2164_vm9 = vweird.f32 %v2456_v37 }
0x14fe   :  { %vm2165_vm11 = vmor %vm2163_vm10, %vm2164_vm9 }
0x14ff   :  { %v2160_v7 = vsub.f32 1.0, %v2159_v5 }
0x1501   :  { %v2161_v38 = vmul.f32 %v2456_v37, %v2160_v7 }
0x1503   :  { %v2162_v13 = vadd.f32 %v2456_v37, %v2161_v38 }
0x1505   :  { %v2166_v43 = vsel %vm2165_vm11, %v2456_v37, %v2162_v13 }
0x1506   :  { %v2171_v46 = vsel %vm2168_vm12, %v2170_v44, %v2166_v43 }
0x1507   :  { %v2184_v51 = vsub.f32 1.0, %v2171_v46  ;;  %v2190_v54 = vmul.f32 %v2171_v46, %v2087_v17 }
0x1543   :  { %v2175_v45 = vpop.permute.xlu2 %2174 }
0x1544   :  { %v2177_v47 = vmul.f32 %v2175_v45, %v2171_v46 }
0x1546   :  { %2179 = vrot.lane.b32.xlu0 %v2177_v47, %s2512_s9 }
0x15b8   :  { %v2180_v48 = vpop.permute.xlu0 %2179 }
0x15b9   :  { %v2182_v49 = vadd.f32 %v2180_v48, %v2121_v33 }
0x15bb   :  { %2457 = vtanh.f32 %v2182_v49 }
0x15c1   :  { %v2458_v50 = vpop.eup %2457 }
0x15c2   :  { %2186 = vrot.lane.b32.xlu1 %v2458_v50, %s2513_s7 }
0x1634   :  { %v2187_v52 = vpop.permute.xlu1 %2186 }
0x1635   :  { %v2189_v55 = vmul.f32 %v2187_v52, %v2184_v51 }
0x1637   :  { %v2191_v56 = vadd.f32 %v2190_v54, %v2189_v55 }
0x1639   :  { %2193 = vrot.lane.b32.xlu2 %v2191_v56, %s2513_s7  ;;  %s2258_s7 = sshll.u32 %s3485_s18, 4  ;;  %s2259_s7 = int_to_ptr.hbm [resolvable:$true] %s2258_s7 }
0x163a   :  { %2261 = dma.vmem_to_hbm [thread:$0]  %s2257_s12, 32, %s2259_s7, [#allocation6]  }
0x1693   :  { %v2194_v58 = vpop.permute.xlu2 %2193 }
0x1694   :  { %2196 = vst.msk [vmem:[#allocation2 + $0xe] sm:$0x3] %vm1352_vm5, %v2194_v58 }
0x169b   :  { %v2198_v60 = vld [vmem:[#allocation2 + $0x8] sm:$0xff] }
0x169c   :  { %2383 = vmatmul.msk.f32.gmra.mxu1 %vm1397_vm6, %v2198_v60 }
0x1719   :  { %v2233_v61 = vpop.f32.mrf.mxu1 }
0x171a   :  { %v2234_v62 = vadd.f32 %v3395_v59, %v2233_v61 }
0x171c   :  { %2237 = vst.msk [vmem:[%s3483_s16 + $0x8] sm:$0xff] %vm63_vm0, %v2234_v62 }
0x171d   :  { %2507 = dma.done.wait [#allocation4], 32  }
0x171e   :  { %2508 = vsyncadd [#allocation4], 4294967264 }
0x171f   :  { %2509 = dma.done.wait [#allocation6], 32  }
0x1720   :  { %2510 = vsyncadd [#allocation6], 4294967264 }
0x1721   :  { %2272 = vsyncpa [#allocation4], 1 }
0x1722   :  { %2273 = vsyncpa [#allocation6], 1 }

</bundles_post_ra>
